<compile_context>
chip_gen: v7x
topology: tpu7x:2x2x1
jax: 0.10.0
libtpu: 0.0.40
codegen_flags: <defaults>
</compile_context>

<pallas_src>
import functools

import jax
import jax.numpy as jnp
from jax.experimental import pallas as pl
from jax.experimental.pallas import tpu as pltpu


# ----------------------------------------------------------------------------
# 3x3 "same" convolution (stride 1, pad 1) + bias + optional fused ReLU.
# One grid step = one image; 9 whole-plane MXU matmuls, f32 accumulation.
# ----------------------------------------------------------------------------
def _conv3x3_kernel(x_ref, w_ref, b_ref, o_ref, *, P, M, relu):
    # x_ref: (1, L, Cin)  bf16  flattened zero-padded image, L = (H+3)*P
    # w_ref: (9, Cin, Cout) bf16  (tap index t = 3*dy + dx)
    # b_ref: (1, Cout)   f32
    # o_ref: (1, M, Cout) bf16   M = H*P flat output (2 junk cols/row kept)
    cout = o_ref.shape[-1]
    # Hoisted bias broadcast: acc starts as the bias.
    acc = jnp.broadcast_to(b_ref[...], (M, cout)).astype(jnp.float32)
    for t in range(9):                       # 9 taps, each one big MXU matmul
        dy, dx = divmod(t, 3)
        off = dy * P + dx                    # static flat shift for this tap
        patch = x_ref[0, pl.ds(off, M), :]   # (M, Cin) bf16
        acc = acc + jnp.dot(patch, w_ref[t],
                            preferred_element_type=jnp.float32)
    if relu:
        acc = jnp.maximum(acc, 0.0)
    o_ref[0] = acc.astype(o_ref.dtype)


def conv3x3(x, w, b, *, relu=True):
    """x: (N,H,W,Cin) bf16, w: (3,3,Cin,Cout) bf16, b: (Cout,) f32 -> (N,H,W,Cout) bf16."""
    N, H, W, Cin = x.shape
    Cout = w.shape[-1]
    P = W + 2                 # padded row length
    M = H * P                 # flat output rows per image (incl. 2 junk cols/row)
    L = (H + 3) * P           # flat padded length (1 top + 2 bottom zero rows)

    # Zero pad (1 top, 2 bottom, 1 left, 1 right) and flatten spatial dims.
    xp = jnp.pad(x, ((0, 0), (1, 2), (1, 1), (0, 0)))
    xf = xp.reshape(N, L, Cin)
    w9 = w.reshape(9, Cin, Cout)
    b2 = b.reshape(1, Cout).astype(jnp.float32)

    kernel = functools.partial(_conv3x3_kernel, P=P, M=M, relu=relu)
    out_flat = pl.pallas_call(
        kernel,
        out_shape=jax.ShapeDtypeStruct((N, M, Cout), jnp.bfloat16),
        grid=(N,),
        in_specs=[
            pl.BlockSpec((1, L, Cin), lambda n: (n, 0, 0)),
            pl.BlockSpec((9, Cin, Cout), lambda n: (0, 0, 0)),
            pl.BlockSpec((1, Cout), lambda n: (0, 0)),
        ],
        out_specs=pl.BlockSpec((1, M, Cout), lambda n: (n, 0, 0)),
        compiler_params=pltpu.CompilerParams(
            dimension_semantics=("parallel",),
            vmem_limit_bytes=48 * 1024 * 1024,   # fits v7x's 64 MiB VMEM
        ),
    )(xf, w9, b2)

    # Un-flatten and drop the 2 junk columns per row.
    return out_flat.reshape(N, H, P, Cout)[:, :, :W, :]


# ----------------------------------------------------------------------------
# 2x2 / stride-2 max-pool: lane-dense 4-way elementwise max.
# ----------------------------------------------------------------------------
def _maxpool2x2_kernel(a_ref, b_ref, c_ref, d_ref, o_ref):
    o_ref[...] = jnp.maximum(jnp.maximum(a_ref[...], b_ref[...]),
                             jnp.maximum(c_ref[...], d_ref[...]))


def maxpool2x2(x):
    N, H, W, C = x.shape
    Ho, Wo = H // 2, W // 2
    # Pre-slice the four pooling phases (XLA strided slices = layout plumbing);
    # the kernel itself is pure lane-dense VPU work with full-tile stores.
    a = x[:, 0::2, 0::2, :]
    b = x[:, 0::2, 1::2, :]
    c = x[:, 1::2, 0::2, :]
    d = x[:, 1::2, 1::2, :]
    spec = pl.BlockSpec((1, Ho, Wo, C), lambda n: (n, 0, 0, 0))
    return pl.pallas_call(
        _maxpool2x2_kernel,
        out_shape=jax.ShapeDtypeStruct((N, Ho, Wo, C), x.dtype),
        grid=(N,),
        in_specs=[spec, spec, spec, spec],
        out_specs=spec,
        compiler_params=pltpu.CompilerParams(
            dimension_semantics=("parallel",)),
    )(a, b, c, d)


# ----------------------------------------------------------------------------
# Parameter construction (deterministic, synthetic; no checkpoint loading).
# Weights stored bf16 (MXU-native), biases f32.
# ----------------------------------------------------------------------------
_VGG_CFG = [
    ("conv1_1", 3, 64), ("conv1_2", 64, 64),
    ("conv2_1", 64, 128), ("conv2_2", 128, 128),
    ("conv3_1", 128, 256), ("conv3_2", 256, 256), ("conv3_3", 256, 256),
    ("conv4_1", 256, 512), ("conv4_2", 512, 512), ("conv4_3", 512, 512),
    ("conv5_1", 512, 512), ("conv5_2", 512, 512), ("conv5_3", 512, 512),
]


def init_vgg16_params(key):
    params = {}
    for idx, (name, cin, cout) in enumerate(_VGG_CFG):
        kw, kb = jax.random.split(jax.random.fold_in(key, idx))
        scale = jnp.sqrt(2.0 / (9.0 * cin))       # kaiming-ish, keeps values finite
        params[name] = {
            "w": (jax.random.normal(kw, (3, 3, cin, cout), jnp.float32)
                  * scale).astype(jnp.bfloat16),
            "b": jax.random.normal(kb, (cout,), jnp.float32) * 0.01,
        }
    return params


# ----------------------------------------------------------------------------
# Forward pass reproducing Vgg16.forward(X, opt).
# Note: F.relu(..., inplace=True) in the torch module mutates conv4_3 /
# conv5_1 / conv5_3 in place, so returning those names returns the ReLU'd
# tensors at runtime — replicated here.
# ----------------------------------------------------------------------------
def vgg16_forward(x_nchw, params, *, vgg_choose="relu5_3", vgg_maxpooling=False):
    # NCHW f32 -> NHWC bf16
    h = jnp.transpose(x_nchw, (0, 2, 3, 1)).astype(jnp.bfloat16)

    def c(name, t, relu=True):
        p = params[name]
        return conv3x3(t, p["w"], p["b"], relu=relu)

    h = c("conv1_1", h)
    h = c("conv1_2", h)
    h = maxpool2x2(h)
    h = c("conv2_1", h)
    h = c("conv2_2", h)
    h = maxpool2x2(h)
    h = c("conv3_1", h)
    h = c("conv3_2", h)
    h = c("conv3_3", h)
    if vgg_choose != "no_maxpool":
        h = maxpool2x2(h)
    h = c("conv4_1", h)
    relu4_1 = h
    h = c("conv4_2", h)
    relu4_2 = h
    h = c("conv4_3", h)          # inplace ReLU in torch => conv4_3 aliases relu4_3
    relu4_3 = h
    if vgg_choose != "no_maxpool" and vgg_maxpooling:
        h = maxpool2x2(h)
    h = c("conv5_1", h)          # inplace ReLU in torch => conv5_1 aliases relu5_1
    relu5_1 = h
    h = c("conv5_2", h)
    relu5_2 = h
    h = c("conv5_3", h)          # inplace ReLU in torch => conv5_3 aliases relu5_3
    relu5_3 = h

    if vgg_choose == "conv4_3":
        out = relu4_3
    elif vgg_choose == "relu4_2":
        out = relu4_2
    elif vgg_choose == "relu4_1":
        out = relu4_1
    elif vgg_choose == "relu4_3":
        out = relu4_3
    elif vgg_choose == "conv5_3":
        out = relu5_3
    elif vgg_choose == "conv5_1":
        out = relu5_1
    elif vgg_choose == "relu5_1":
        out = relu5_1
    elif vgg_choose == "relu5_2":
        out = relu5_2
    else:  # 'relu5_3' / 'maxpool' (torch's `or 'maxpool'` branch is always truthy)
        out = relu5_3

    # NHWC bf16 -> NCHW f32 to match the PyTorch output convention
    return jnp.transpose(out, (0, 3, 1, 2)).astype(jnp.float32)


if __name__ == "__main__":
    key = jax.random.PRNGKey(0)
    k_params, k_x = jax.random.split(key)

    # Small, module-consistent shapes: batch=2, RGB input, 16x16 spatial (NCHW).
    x = jax.random.normal(k_x, (2, 3, 16, 16), jnp.float32)
    params = init_vgg16_params(k_params)

    out = vgg16_forward(x, params, vgg_choose="relu5_3", vgg_maxpooling=False)
    out = jax.block_until_ready(out)

    # Expected: spatial 16 -> 8 -> 4 -> 2 after three max-pools, 512 channels.
    assert out.shape == (2, 512, 2, 2), out.shape
    assert bool(jnp.isfinite(out).all())
    print("KERNEL_OK")
</pallas_src>

<mosaic_0001>
module attributes {stable_mosaic.version = 11 : i64} {
  func.func @_conv3x3_kernel(%arg0: i32, %arg1: memref<1x342x3xbf16, #tpu.memory_space<vmem>>, %arg2: memref<9x3x64xbf16, #tpu.memory_space<vmem>>, %arg3: memref<1x64xf32, #tpu.memory_space<vmem>>, %arg4: memref<1x288x64xbf16, #tpu.memory_space<vmem>>) attributes {dimension_semantics = [#tpu.dimension_semantics<parallel>], iteration_bounds = array<i64: 2>, scalar_prefetch = 0 : i64, scratch_operands = 0 : i64, tpu.core_type = #tpu.core_type<tc>, window_params = [{transform_indices = @transform_0, window_bounds = array<i64: 1, 342, 3>}, {pipeline_mode = #tpu.pipeline_mode<synchronous>, transform_indices = @transform_1, window_bounds = array<i64: 9, 3, 64>}, {pipeline_mode = #tpu.pipeline_mode<synchronous>, transform_indices = @transform_2, window_bounds = array<i64: 1, 64>}, {transform_indices = @transform_3, window_bounds = array<i64: 1, 288, 64>}]} {
    %c0 = arith.constant 0 : index
    %c0_0 = arith.constant 0 : index
    %0 = vector.load %arg3[%c0, %c0_0] : memref<1x64xf32, #tpu.memory_space<vmem>>, vector<1x64xf32>
    %1 = vector.shape_cast %0 : vector<1x64xf32> to vector<1x64xf32>
    %2 = vector.broadcast %1 : vector<1x64xf32> to vector<288x64xf32>
    %c0_1 = arith.constant 0 : index
    %c0_2 = arith.constant 0 : index
    %c0_3 = arith.constant 0 : index
    %3 = vector.load %arg1[%c0_1, %c0_2, %c0_3] : memref<1x342x3xbf16, #tpu.memory_space<vmem>>, vector<1x288x3xbf16>
    %4 = vector.shape_cast %3 : vector<1x288x3xbf16> to vector<288x3xbf16>
    %c0_4 = arith.constant 0 : index
    %c0_5 = arith.constant 0 : index
    %c0_6 = arith.constant 0 : index
    %5 = vector.load %arg2[%c0_4, %c0_5, %c0_6] : memref<9x3x64xbf16, #tpu.memory_space<vmem>>, vector<1x3x64xbf16>
    %6 = vector.shape_cast %5 : vector<1x3x64xbf16> to vector<3x64xbf16>
    %cst = arith.constant dense<0.000000e+00> : vector<288x64xf32>
    %7 = tpu.matmul %4, %6, %cst {dimension_numbers = #tpu.dot_dimension_numbers<[1], [0], [0], [1], [0, 0, 1, 1], [], []>} : vector<288x3xbf16>, vector<3x64xbf16>, vector<288x64xf32> -> vector<288x64xf32>
    %8 = arith.addf %2, %7 : vector<288x64xf32>
    %c0_7 = arith.constant 0 : index
    %c1 = arith.constant 1 : index
    %c0_8 = arith.constant 0 : index
    %9 = vector.load %arg1[%c0_7, %c1, %c0_8] : memref<1x342x3xbf16, #tpu.memory_space<vmem>>, vector<1x288x3xbf16>
    %10 = vector.shape_cast %9 : vector<1x288x3xbf16> to vector<288x3xbf16>
    %c1_9 = arith.constant 1 : index
    %c0_10 = arith.constant 0 : index
    %c0_11 = arith.constant 0 : index
    %11 = vector.load %arg2[%c1_9, %c0_10, %c0_11] : memref<9x3x64xbf16, #tpu.memory_space<vmem>>, vector<1x3x64xbf16>
    %12 = vector.shape_cast %11 : vector<1x3x64xbf16> to vector<3x64xbf16>
    %cst_12 = arith.constant dense<0.000000e+00> : vector<288x64xf32>
    %13 = tpu.matmul %10, %12, %cst_12 {dimension_numbers = #tpu.dot_dimension_numbers<[1], [0], [0], [1], [0, 0, 1, 1], [], []>} : vector<288x3xbf16>, vector<3x64xbf16>, vector<288x64xf32> -> vector<288x64xf32>
    %14 = arith.addf %8, %13 : vector<288x64xf32>
    %c0_13 = arith.constant 0 : index
    %c2 = arith.constant 2 : index
    %c0_14 = arith.constant 0 : index
    %15 = vector.load %arg1[%c0_13, %c2, %c0_14] : memref<1x342x3xbf16, #tpu.memory_space<vmem>>, vector<1x288x3xbf16>
    %16 = vector.shape_cast %15 : vector<1x288x3xbf16> to vector<288x3xbf16>
    %c2_15 = arith.constant 2 : index
    %c0_16 = arith.constant 0 : index
    %c0_17 = arith.constant 0 : index
    %17 = vector.load %arg2[%c2_15, %c0_16, %c0_17] : memref<9x3x64xbf16, #tpu.memory_space<vmem>>, vector<1x3x64xbf16>
    %18 = vector.shape_cast %17 : vector<1x3x64xbf16> to vector<3x64xbf16>
    %cst_18 = arith.constant dense<0.000000e+00> : vector<288x64xf32>
    %19 = tpu.matmul %16, %18, %cst_18 {dimension_numbers = #tpu.dot_dimension_numbers<[1], [0], [0], [1], [0, 0, 1, 1], [], []>} : vector<288x3xbf16>, vector<3x64xbf16>, vector<288x64xf32> -> vector<288x64xf32>
    %20 = arith.addf %14, %19 : vector<288x64xf32>
    %c0_19 = arith.constant 0 : index
    %c18 = arith.constant 18 : index
    %c0_20 = arith.constant 0 : index
    %21 = vector.load %arg1[%c0_19, %c18, %c0_20] : memref<1x342x3xbf16, #tpu.memory_space<vmem>>, vector<1x288x3xbf16>
    %22 = vector.shape_cast %21 : vector<1x288x3xbf16> to vector<288x3xbf16>
    %c3 = arith.constant 3 : index
    %c0_21 = arith.constant 0 : index
    %c0_22 = arith.constant 0 : index
    %23 = vector.load %arg2[%c3, %c0_21, %c0_22] : memref<9x3x64xbf16, #tpu.memory_space<vmem>>, vector<1x3x64xbf16>
    %24 = vector.shape_cast %23 : vector<1x3x64xbf16> to vector<3x64xbf16>
    %cst_23 = arith.constant dense<0.000000e+00> : vector<288x64xf32>
    %25 = tpu.matmul %22, %24, %cst_23 {dimension_numbers = #tpu.dot_dimension_numbers<[1], [0], [0], [1], [0, 0, 1, 1], [], []>} : vector<288x3xbf16>, vector<3x64xbf16>, vector<288x64xf32> -> vector<288x64xf32>
    %26 = arith.addf %20, %25 : vector<288x64xf32>
    %c0_24 = arith.constant 0 : index
    %c19 = arith.constant 19 : index
    %c0_25 = arith.constant 0 : index
    %27 = vector.load %arg1[%c0_24, %c19, %c0_25] : memref<1x342x3xbf16, #tpu.memory_space<vmem>>, vector<1x288x3xbf16>
    %28 = vector.shape_cast %27 : vector<1x288x3xbf16> to vector<288x3xbf16>
    %c4 = arith.constant 4 : index
    %c0_26 = arith.constant 0 : index
    %c0_27 = arith.constant 0 : index
    %29 = vector.load %arg2[%c4, %c0_26, %c0_27] : memref<9x3x64xbf16, #tpu.memory_space<vmem>>, vector<1x3x64xbf16>
    %30 = vector.shape_cast %29 : vector<1x3x64xbf16> to vector<3x64xbf16>
    %cst_28 = arith.constant dense<0.000000e+00> : vector<288x64xf32>
    %31 = tpu.matmul %28, %30, %cst_28 {dimension_numbers = #tpu.dot_dimension_numbers<[1], [0], [0], [1], [0, 0, 1, 1], [], []>} : vector<288x3xbf16>, vector<3x64xbf16>, vector<288x64xf32> -> vector<288x64xf32>
    %32 = arith.addf %26, %31 : vector<288x64xf32>
    %c0_29 = arith.constant 0 : index
    %c20 = arith.constant 20 : index
    %c0_30 = arith.constant 0 : index
    %33 = vector.load %arg1[%c0_29, %c20, %c0_30] : memref<1x342x3xbf16, #tpu.memory_space<vmem>>, vector<1x288x3xbf16>
    %34 = vector.shape_cast %33 : vector<1x288x3xbf16> to vector<288x3xbf16>
    %c5 = arith.constant 5 : index
    %c0_31 = arith.constant 0 : index
    %c0_32 = arith.constant 0 : index
    %35 = vector.load %arg2[%c5, %c0_31, %c0_32] : memref<9x3x64xbf16, #tpu.memory_space<vmem>>, vector<1x3x64xbf16>
    %36 = vector.shape_cast %35 : vector<1x3x64xbf16> to vector<3x64xbf16>
    %cst_33 = arith.constant dense<0.000000e+00> : vector<288x64xf32>
    %37 = tpu.matmul %34, %36, %cst_33 {dimension_numbers = #tpu.dot_dimension_numbers<[1], [0], [0], [1], [0, 0, 1, 1], [], []>} : vector<288x3xbf16>, vector<3x64xbf16>, vector<288x64xf32> -> vector<288x64xf32>
    %38 = arith.addf %32, %37 : vector<288x64xf32>
    %c0_34 = arith.constant 0 : index
    %c36 = arith.constant 36 : index
    %c0_35 = arith.constant 0 : index
    %39 = vector.load %arg1[%c0_34, %c36, %c0_35] : memref<1x342x3xbf16, #tpu.memory_space<vmem>>, vector<1x288x3xbf16>
    %40 = vector.shape_cast %39 : vector<1x288x3xbf16> to vector<288x3xbf16>
    %c6 = arith.constant 6 : index
    %c0_36 = arith.constant 0 : index
    %c0_37 = arith.constant 0 : index
    %41 = vector.load %arg2[%c6, %c0_36, %c0_37] : memref<9x3x64xbf16, #tpu.memory_space<vmem>>, vector<1x3x64xbf16>
    %42 = vector.shape_cast %41 : vector<1x3x64xbf16> to vector<3x64xbf16>
    %cst_38 = arith.constant dense<0.000000e+00> : vector<288x64xf32>
    %43 = tpu.matmul %40, %42, %cst_38 {dimension_numbers = #tpu.dot_dimension_numbers<[1], [0], [0], [1], [0, 0, 1, 1], [], []>} : vector<288x3xbf16>, vector<3x64xbf16>, vector<288x64xf32> -> vector<288x64xf32>
    %44 = arith.addf %38, %43 : vector<288x64xf32>
    %c0_39 = arith.constant 0 : index
    %c37 = arith.constant 37 : index
    %c0_40 = arith.constant 0 : index
    %45 = vector.load %arg1[%c0_39, %c37, %c0_40] : memref<1x342x3xbf16, #tpu.memory_space<vmem>>, vector<1x288x3xbf16>
    %46 = vector.shape_cast %45 : vector<1x288x3xbf16> to vector<288x3xbf16>
    %c7 = arith.constant 7 : index
    %c0_41 = arith.constant 0 : index
    %c0_42 = arith.constant 0 : index
    %47 = vector.load %arg2[%c7, %c0_41, %c0_42] : memref<9x3x64xbf16, #tpu.memory_space<vmem>>, vector<1x3x64xbf16>
    %48 = vector.shape_cast %47 : vector<1x3x64xbf16> to vector<3x64xbf16>
    %cst_43 = arith.constant dense<0.000000e+00> : vector<288x64xf32>
    %49 = tpu.matmul %46, %48, %cst_43 {dimension_numbers = #tpu.dot_dimension_numbers<[1], [0], [0], [1], [0, 0, 1, 1], [], []>} : vector<288x3xbf16>, vector<3x64xbf16>, vector<288x64xf32> -> vector<288x64xf32>
    %50 = arith.addf %44, %49 : vector<288x64xf32>
    %c0_44 = arith.constant 0 : index
    %c38 = arith.constant 38 : index
    %c0_45 = arith.constant 0 : index
    %51 = vector.load %arg1[%c0_44, %c38, %c0_45] : memref<1x342x3xbf16, #tpu.memory_space<vmem>>, vector<1x288x3xbf16>
    %52 = vector.shape_cast %51 : vector<1x288x3xbf16> to vector<288x3xbf16>
    %c8 = arith.constant 8 : index
    %c0_46 = arith.constant 0 : index
    %c0_47 = arith.constant 0 : index
    %53 = vector.load %arg2[%c8, %c0_46, %c0_47] : memref<9x3x64xbf16, #tpu.memory_space<vmem>>, vector<1x3x64xbf16>
    %54 = vector.shape_cast %53 : vector<1x3x64xbf16> to vector<3x64xbf16>
    %cst_48 = arith.constant dense<0.000000e+00> : vector<288x64xf32>
    %55 = tpu.matmul %52, %54, %cst_48 {dimension_numbers = #tpu.dot_dimension_numbers<[1], [0], [0], [1], [0, 0, 1, 1], [], []>} : vector<288x3xbf16>, vector<3x64xbf16>, vector<288x64xf32> -> vector<288x64xf32>
    %56 = arith.addf %50, %55 : vector<288x64xf32>
    %cst_49 = arith.constant 0.000000e+00 : f32
    %57 = vector.broadcast %cst_49 : f32 to vector<288x64xf32>
    %58 = arith.maximumf %56, %57 : vector<288x64xf32>
    %59 = arith.truncf %58 : vector<288x64xf32> to vector<288x64xbf16>
    %c0_50 = arith.constant 0 : index
    %c0_51 = arith.constant 0 : index
    %c0_52 = arith.constant 0 : index
    %60 = vector.load %arg4[%c0_50, %c0_51, %c0_52] : memref<1x288x64xbf16, #tpu.memory_space<vmem>>, vector<1x288x64xbf16>
    %61 = vector.shape_cast %60 : vector<1x288x64xbf16> to vector<288x64xbf16>
    %62 = vector.shape_cast %59 : vector<288x64xbf16> to vector<1x288x64xbf16>
    tpu.vector_store %arg4[%c0_50, %c0_51, %c0_52], %62 {strides = array<i32>} : memref<1x288x64xbf16, #tpu.memory_space<vmem>>, vector<1x288x64xbf16>,
    return
  }
  func.func @transform_0(%arg0: i32) -> (i32, i32, i32) {
    %c0_i32 = arith.constant 0 : i32
    %c0_i32_0 = arith.constant 0 : i32
    %c0_i32_1 = arith.constant 0 : i32
    return %arg0, %c0_i32, %c0_i32_0 : i32, i32, i32
  }
  func.func @transform_1(%arg0: i32) -> (i32, i32, i32) {
    %c0_i32 = arith.constant 0 : i32
    %c0_i32_0 = arith.constant 0 : i32
    %c0_i32_1 = arith.constant 0 : i32
    %c0_i32_2 = arith.constant 0 : i32
    return %c0_i32, %c0_i32_0, %c0_i32_1 : i32, i32, i32
  }
  func.func @transform_2(%arg0: i32) -> (i32, i32) {
    %c0_i32 = arith.constant 0 : i32
    %c0_i32_0 = arith.constant 0 : i32
    %c0_i32_1 = arith.constant 0 : i32
    return %c0_i32, %c0_i32_0 : i32, i32
  }
  func.func @transform_3(%arg0: i32) -> (i32, i32, i32) {
    %c0_i32 = arith.constant 0 : i32
    %c0_i32_0 = arith.constant 0 : i32
    %c0_i32_1 = arith.constant 0 : i32
    return %arg0, %c0_i32, %c0_i32_0 : i32, i32, i32
  }
}

</mosaic_0001>

<bundles_post_ra>
// kernel: tpu_custom_call.1
= control target key start
LH: loop header
LB: loop body
LE: loop exit
PB: predicated region body
PF: predicated region fallthrough
CT: control target
= control target key end

     0   :  { %s5420_s12 = smov 0   ;;  %s6449_s0 = inlined_call_operand.vmem [shape: bf16[2,342,3], index: 0, kind: input, shape index: {}]   ;;  %s6450_s1 = inlined_call_operand.vmem [shape: bf16[9,3,64], index: 1, kind: input, shape index: {}]   ;;  %s6451_s2 = inlined_call_operand.vmem [shape: f32[1,64], index: 2, kind: input, shape index: {}]   ;;  %s6452_s3 = inlined_call_operand.vmem [shape: bf16[2,288,64], index: 3, kind: output, shape index: {}]  }
   0x1 LB: > { %s4118_s13 = sadd.s32 4294967295, %s5397_s12   ;;  %p4122_p0 = scmp.ge.s32.totalorder %s5397_s12, 1  ;;  %s5397_s12 = sphi %s5420_s12, %s13_s12  }
   0x2   : > { %p137_p1 = scmp.lt.s32.totalorder %s5397_s12, 3 }
   0x4   : > { %p138_p2 = pnand %p4122_p0, %p137_p1 }
   0x5   : > { %v215_v0 = vld [vmem:[%s6450_s1] sm:$0x3] (!%p138_p2)  ;;  %vm361_vm0 = vcmask (!%p138_p2), 1040384   ;;  %vm362_vm1 = vcmask (!%p138_p2), 1041408   ;;  %p161_p3 = scmp.lt.s32.totalorder (!%p138_p2), %s4118_s13, 1  ;;  %v5399_v1 = vmov (!%p138_p2), 65535  }
   0x6   : > { %141 = sbr.rel (%p138_p2) target bundleno = 571 (0x23b), region = 32  ;;  %v363_v2 = vsel (!%p138_p2), %vm361_vm0, 4294967295, %v5399_v1  ;;  %v4258_v3 = vld [vmem:[%s6450_s1 + $0x8] sm:$0x3] (!%p138_p2)  ;;  %v4278_v5 = vld [vmem:[%s6450_s1 + $0xa] sm:$0x3] (!%p138_p2) }
   0x7   : > { %v5434_v4 = vsel (!%p138_p2), %vm362_vm1, %v363_v2, 0  ;;  %v4162_v6 = vld [vmem:[%s6450_s1 + $0x2] sm:$0x3] (!%p138_p2)  ;;  %v4200_v11 = vld [vmem:[%s6450_s1 + $0x4] sm:$0x3] (!%p138_p2)  ;;  %vm306_vm2 = vcmask (!%p138_p2), 23552  }
   0x8   : > { %v366_v7 = vand.u32 (!%p138_p2), %v5434_v4, %v215_v0  ;;  %v5446_v8 = vand.u32 (!%p138_p2), %v4258_v3, %v5434_v4  ;;  %v5449_v9 = vand.u32 (!%p138_p2), %v4278_v5, %v5434_v4  ;;  %v917_v10 = vand.u32 (!%p138_p2), %v4162_v6, %v5434_v4  ;;  %v4298_v33 = vld [vmem:[%s6450_s1 + $0xc] sm:$0x3] (!%p138_p2) }
   0x9   : > { %vm1891_vm3 = vsmask.f32 (!%p138_p2), 6400  ;;  %v5467_v14 = vand.u32 (!%p138_p2), %v4200_v11, %v5434_v4  ;;  %v5516_v50 = vand.u32 (!%p138_p2), %v4298_v33, %v5434_v4  ;;  %vm2338_vm4 = vcmask (!%p138_p2), 1045504  }
   0xa   : > { %4621 = vmatprep.subr.bf16.mxu1 (!%p138_p2), %v366_v7  ;;  %4773 = vmatprep.subr.bf16.mxu0 (!%p138_p2), %v5446_v8  ;;  %vm713_vm5 = vsmask.f32 (!%p138_p2), 7424  ;;  %vm1138_vm6 = vcmask (!%p138_p2), 1046528   ;;  %vm3091_vm7 = vsmask.f32 (!%p138_p2), 5376  ;;  %vm3538_vm8 = vcmask (!%p138_p2), 1044480  }
   0xb   : > { %4622 = vmatpush3.bf16.msra.mxu1 (!%p138_p2), %v366_v7  ;;  %4774 = vmatpush3.bf16.msra.mxu0 (!%p138_p2), %v5446_v8  ;;  %vm4026_vm9 = vcmask (!%p138_p2), 519168  }
   0xc   : > { %4811 = vmatprep.subr.bf16.mxu0 (!%p138_p2), %v5449_v9  ;;  %4659 = vmatprep.subr.bf16.mxu1 (!%p138_p2), %v917_v10 }
   0xd   : > { %s6454_s13 = smov (!%p161_p3, %s4118_s13), 1 }
   0xe   : > { %s5289_s22 = smul.u32 172, %s6454_s13 }
   0xf   : > { %s5290_s11 = smul.u32 144, %s6454_s13 }
  0x10   : > { %s5460_s27 = scalar_lea.vmem %s6449_s0, %s5289_s22 }
  0x11   : > { %v5300_v12 = vld [vmem:[%s5460_s27] sm:$0xff]   ;;  %v5301_v13 = vld [vmem:[%s5460_s27 + $0x8] sm:$0xff]   ;;  %v5479_v18 = vld [vmem:[%s5460_s27 + $0x10] sm:$0xff]   ;;  %s6306_s16 = scalar_lea.vmem %s6452_s3, %s5290_s11 }
  0x12   : > { %4623 = vmatprep.mubr.msk.bf16.mxu1 %vm306_vm2, %v5300_v12  ;;  %v1446_v15 = vld [vmem:[%s5460_s27 + $0x8] sm:$0xe]  ;;  %v5472_v16 = vld [vmem:[%s5460_s27 + $0xc] sm:$0xf]  ;;  %v5304_v19 = vld [vmem:[%s5460_s27 + $0x10] sm:$0xff]   ;;  %v1901_v22 = vshrl.u32 %v5479_v18, 16 }
  0x13   : > { %4624 = vmatmul.mubr.msk.bf16.vlgmr.msra.gmra.mrb[0].mxu1 %vm306_vm2, %v5301_v13  ;;  %v5476_v17 = vcombine.low %v1446_v15, %v5472_v16  ;;  %v1904_v23 = vshll.u32 %v5479_v18, 16  ;;  %v5489_v24 = vld [vmem:[%s5460_s27 + $0x18] sm:$0xff]   ;;  %v5493_v30 = vld [vmem:[%s5460_s27 + $0x20] sm:$0xff]   ;;  %v5504_v41 = vld [vmem:[%s5460_s27 + $0x28] sm:$0xff]  }
  0x14   : > { %4660 = vmatpush3.bf16.msra.mxu1 %v917_v10  ;;  %4627 = vmatprep.mubr.msk.bf16.mxu1 %vm306_vm2, %v5304_v19  ;;  %v1903_v27 = vrot.slane %v1901_v22, 1  ;;  %v5306_v29 = vld [vmem:[%s5460_s27 + $0x18] sm:$0xff]   ;;  %v1910_v31 = vshrl.u32 %v5489_v24, 16  ;;  %v1913_v32 = vshll.u32 %v5489_v24, 16  ;;  %v1919_v36 = vshrl.u32 %v5493_v30, 16  ;;  %v5308_v40 = vld [vmem:[%s5460_s27 + $0x20] sm:$0xff]  }
  0x15   : > { %v1893_v20 = vshrl.u32 %v5476_v17, 16  ;;  %v1896_v21 = vshll.u32 %v5476_v17, 16  ;;  %4697 = vmatprep.subr.bf16.mxu1 %v5467_v14  ;;  %v1906_v28 = vrot.slane %v1904_v23, 2  ;;  %v1922_v37 = vshll.u32 %v5493_v30, 16  ;;  %v5513_v48 = vld [vmem:[%s5460_s27 + $0x30] sm:$0xff]   ;;  %v5310_v54 = vld [vmem:[%s5460_s27 + $0x28] sm:$0xff]  }
  0x16   : > { %v1912_v38 = vrot.slane %v1910_v31, 1  ;;  %v1915_v39 = vrot.slane %v1913_v32, 2  ;;  %v1921_v43 = vrot.slane %v1919_v36, 1  ;;  %v1928_v46 = vshrl.u32 %v5504_v41, 16  ;;  %v5525_v58 = vld [vmem:[%s5460_s27 + $0x38] sm:$0xff]   ;;  %v5312_v61 = vld [vmem:[%s5460_s27 + $0x30] sm:$0xff]  }
  0x17   : > { %v1895_v25 = vrot.slane %v1893_v20, 1  ;;  %v1898_v26 = vrot.slane %v1896_v21, 2  ;;  %v1907_v35 = vor.u32 %v1906_v28, %v1903_v27  ;;  %v1924_v44 = vrot.slane %v1922_v37, 2  ;;  %v5533_v1 = vld [vmem:[%s5460_s27 + $0x40] sm:$0xff]   ;;  %v5542_v10 = vld [vmem:[%s5460_s27 + $0x48] sm:$0xff]   ;;  %v5546_v15 = vld [vmem:[%s5460_s27 + $0x50] sm:$0xff]  }
  0x18   : > { %v1916_v45 = vor.u32 %v1915_v39, %v1912_v38  ;;  %v1931_v47 = vshll.u32 %v5504_v41, 16  ;;  %v1930_v52 = vrot.slane %v1928_v46, 1  ;;  %v1937_v55 = vshrl.u32 %v5513_v48, 16  ;;  %v5314_v19 = vld [vmem:[%s5460_s27 + $0x38] sm:$0xff]   ;;  %v5316_v22 = vld [vmem:[%s5460_s27 + $0x40] sm:$0xff]   ;;  %v5318_v36 = vld [vmem:[%s5460_s27 + $0x48] sm:$0xff]  }
  0x19   : > { %v1899_v34 = vor.u32 %v1898_v26, %v1895_v25  ;;  %v1925_v49 = vor.u32 %v1924_v44, %v1921_v43  ;;  %v1940_v57 = vshll.u32 %v5513_v48, 16  ;;  %v1946_v63 = vshrl.u32 %v5525_v58, 16  ;;  %v5560_v32 = vld [vmem:[%s5460_s27 + $0x58] sm:$0xff]   ;;  %v5320_v38 = vld [vmem:[%s5460_s27 + $0x50] sm:$0xff]   ;;  %v2332_v43 = vld [vmem:[%s5460_s27 + $0x8] sm:$0xc] }
  0x1a   : > { %v1917_v51 = vsel %vm1891_vm3, %v1907_v35, %v1916_v45  ;;  %v1933_v53 = vrot.slane %v1931_v47, 2  ;;  %v1939_v60 = vrot.slane %v1937_v55, 1  ;;  %v1949_v0 = vshll.u32 %v5525_v58, 16 }
  0x1b   : > { %v1908_v42 = vsel %vm1891_vm3, %v1899_v34, %v1907_v35  ;;  %4628 = vmatmul.mubr.msk.bf16.gmra.mrb[4].mxu1 %vm306_vm2, %v5306_v29  ;;  %v1926_v56 = vsel %vm1891_vm3, %v1916_v45, %v1925_v49  ;;  %v1942_v62 = vrot.slane %v1940_v57, 2  ;;  %v1948_v3 = vrot.slane %v1946_v63, 1  ;;  %v581_v57 = vld [vmem:[%s5460_s27] sm:$0xf] }
  0x1c   : > { %4775 = vmatprep.mubr.msk.bf16.mxu0 %vm306_vm2, %v1908_v42  ;;  %4631 = vmatprep.mubr.msk.bf16.mxu1 %vm306_vm2, %v5308_v40  ;;  %v1934_v59 = vor.u32 %v1933_v53, %v1930_v52  ;;  %v1951_v5 = vrot.slane %v1949_v0, 2  ;;  %v1955_v6 = vshrl.u32 %v5533_v1, 16  ;;  %v1964_v20 = vshrl.u32 %v5542_v10, 16  ;;  %v5324_v53 = vld [vmem:[%s5460_s27 + $0x60] sm:$0xff]   ;;  %v4336_v0 = vld [vmem:[%s6450_s1 + $0xe] sm:$0x3] }
  0x1d   : > { %4776 = vmatmul.mubr.msk.bf16.vlgmr.msra.gmra.mrb[0].mxu0 %vm306_vm2, %v1917_v51  ;;  %v1943_v2 = vor.u32 %v1942_v62, %v1939_v60  ;;  %v1967_v23 = vshll.u32 %v5542_v10, 16  ;;  %v1973_v26 = vshrl.u32 %v5546_v15, 16  ;;  %v1976_v27 = vshll.u32 %v5546_v15, 16  ;;  %v5322_v51 = vld [vmem:[%s5460_s27 + $0x58] sm:$0xff]  }
  0x1e   : > { %4812 = vmatpush3.bf16.msra.mxu0 %v5449_v9  ;;  %4779 = vmatprep.mubr.msk.bf16.mxu0 %vm306_vm2, %v1926_v56  ;;  %v1935_v7 = vsel %vm1891_vm3, %v1925_v49, %v1934_v59  ;;  %v1958_v9 = vshll.u32 %v5533_v1, 16  ;;  %v1957_v12 = vrot.slane %v1955_v6, 1  ;;  %v1952_v21 = vor.u32 %v1951_v5, %v1948_v3  ;;  %v5606_v3 = vld [vmem:[%s5460_s27 + $0x8] sm:$0xff]   ;;  %v5327_v6 = vld [vmem:[%s5460_s27 + $0x78] sm:$0xff]  }
  0x1f   : > { %4849 = vmatprep.subr.bf16.mxu0 %v5516_v50  ;;  %v1944_v11 = vsel %vm1891_vm3, %v1934_v59, %v1943_v2  ;;  %v1966_v28 = vrot.slane %v1964_v20, 1  ;;  %v1969_v31 = vrot.slane %v1967_v23, 2  ;;  %v1975_v34 = vrot.slane %v1973_v26, 1  ;;  %v5589_v59 = vld [vmem:[%s5460_s27 + $0x4] sm:$0xf]  ;;  %v5622_v20 = vld [vmem:[%s5460_s27 + $0x10] sm:$0xff]  }
  0x20   : > { %v1960_v13 = vrot.slane %v1958_v9, 2  ;;  %v1953_v29 = vsel %vm1891_vm3, %v1943_v2, %v1952_v21  ;;  %v1978_v35 = vrot.slane %v1976_v27, 2  ;;  %v1982_v39 = vshrl.u32 %v5560_v32, 16  ;;  %v5328_v9 = vld [vmem:[%s5460_s27 + $0x80] sm:$0xff]   ;;  %v5329_v23 = vld [vmem:[%s5460_s27 + $0x88] sm:$0xff]  }
  0x21   : > { %v1970_v37 = vor.u32 %v1969_v31, %v1966_v28  ;;  %v1985_v40 = vshll.u32 %v5560_v32, 16  ;;  %v4279_v49 = vcombine.low %v2332_v43, %v5472_v16  ;;  %v2340_v55 = vrot.slane %v5479_v18, 2  ;;  %v5325_v18 = vld [vmem:[%s5460_s27 + $0x68] sm:$0xff]  }
  0x22   : > { %v1961_v25 = vor.u32 %v1960_v13, %v1957_v12  ;;  %v1979_v42 = vor.u32 %v1978_v35, %v1975_v34  ;;  %v1984_v45 = vrot.slane %v1982_v39, 1  ;;  %v2342_v60 = vrot.slane %v5489_v24, 2  ;;  %v5641_v34 = vld [vmem:[%s5460_s27 + $0x20] sm:$0xff]   ;;  %v5648_v39 = vld [vmem:[%s5460_s27 + $0x28] sm:$0xff]  }
  0x23   : > { %4632 = vmatmul.mubr.msk.bf16.gmra.mrb[8].mxu1 %vm306_vm2, %v5310_v54  ;;  %v1987_v46 = vrot.slane %v1985_v40, 2  ;;  %v2339_v54 = vrot.slane %v4279_v49, 2  ;;  %v2344_v62 = vrot.slane %v5493_v30, 2  ;;  %v4163_v63 = vcombine.low %v581_v57, %v5589_v59  ;;  %v5672_v57 = vld [vmem:[%s5460_s27 + $0x38] sm:$0xff]  }
  0x24   : > { %4635 = vmatprep.mubr.msk.bf16.mxu1 %vm306_vm2, %v5312_v61  ;;  %v1962_v33 = vsel %vm1891_vm3, %v1952_v21, %v1961_v25  ;;  %v1971_v44 = vsel %vm1891_vm3, %v1961_v25, %v1970_v37  ;;  %v1980_v47 = vsel %vm1891_vm3, %v1970_v37, %v1979_v42  ;;  %v5326_v61 = vld [vmem:[%s5460_s27 + $0x70] sm:$0xff]   ;;  %v2343_v2 = vsel %vm2338_vm4, %v2340_v55, %v2342_v60 }
  0x25   : > { %4780 = vmatmul.mubr.msk.bf16.gmra.mrb[4].mxu0 %vm306_vm2, %v1935_v7  ;;  %v5578_v52 = vor.u32 %v1987_v46, %v1984_v45  ;;  %v2341_v16 = vsel %vm2338_vm4, %v2339_v54, %v2340_v55  ;;  %v2345_v24 = vsel %vm2338_vm4, %v2342_v60, %v2344_v62  ;;  %v717_v5 = vshll.u32 %v4163_v63, 16  ;;  %v5658_v46 = vld [vmem:[%s5460_s27 + $0x60] sm:$0xff]   ;;  %v5338_v54 = vld [vmem:[%s5460_s27 + $0x30] sm:$0xff]  }
  0x26   : > { %4783 = vmatprep.mubr.msk.bf16.mxu0 %vm306_vm2, %v1944_v11  ;;  %v5609_v30 = vand.u32 %v4336_v0, %v5434_v4  ;;  %v2346_v7 = vrot.slane %v5504_v41, 2  ;;  %v2348_v11 = vrot.slane %v5513_v48, 2  ;;  %v715_v12 = vshrl.u32 %v4163_v63, 16  ;;  %v5628_v48 = vld [vmem:[%s5460_s27 + $0x18] sm:$0xff]   ;;  %v1132_v60 = vld [vmem:[%s5460_s27] sm:$0xe] }
  0x27   : > { %v1989_v56 = vsel %vm1891_vm3, %v1979_v42, %v5578_v52  ;;  %v719_v13 = vrot.slane %v717_v5, 1  ;;  %v730_v25 = vshll.u32 %v5622_v20, 16  ;;  %v2350_v26 = vrot.slane %v5525_v58, 2 }
  0x28   : > { %v2349_v41 = vsel %vm2338_vm4, %v2346_v7, %v2348_v11  ;;  %v726_v27 = vshrl.u32 %v5606_v3, 16  ;;  %v2352_v28 = vrot.slane %v5533_v1, 2  ;;  %v734_v31 = vshrl.u32 %v5622_v20, 16 }
  0x29   : > { %v720_v21 = vor.u32 %v719_v13, %v715_v12  ;;  %v732_v35 = vrot.slane %v730_v25, 1  ;;  %v746_v40 = vshll.u32 %v5641_v34, 16  ;;  %v2354_v42 = vrot.slane %v5542_v10, 2 }
  0x2a   : > { %v2353_v58 = vsel %vm2338_vm4, %v2350_v26, %v2352_v28  ;;  %v742_v43 = vshrl.u32 %v5628_v48, 16  ;;  %v2356_v45 = vrot.slane %v5546_v15, 2  ;;  %v2358_v49 = vrot.slane %v5560_v32, 2 }
  0x2b   : > { %4636 = vmatmul.mubr.msk.bf16.gmra.mrb[12].mxu1 %vm306_vm2, %v5314_v19  ;;  %v722_v19 = vshll.u32 %v5606_v3, 16  ;;  %v736_v1 = vor.u32 %v734_v31, %v732_v35  ;;  %v754_v10 = vshll.u32 %v5648_v39, 16  ;;  %v748_v55 = vrot.slane %v746_v40, 1 }
  0x2c   : > { %4639 = vmatprep.mubr.msk.bf16.mxu1 %vm306_vm2, %v5316_v22  ;;  %v2357_v32 = vsel %vm2338_vm4, %v2354_v42, %v2356_v45  ;;  %v766_v12 = vshrl.u32 %v5338_v54, 16 }
  0x2d   : > { %4784 = vmatmul.mubr.msk.bf16.gmra.mrb[8].mxu0 %vm306_vm2, %v1953_v29  ;;  %v724_v22 = vrot.slane %v722_v19, 1  ;;  %v756_v0 = vrot.slane %v754_v10, 1  ;;  %v1146_v19 = vrot.slane %v5641_v34, 1 }
  0x2e   : > { %4787 = vmatprep.mubr.msk.bf16.mxu0 %vm306_vm2, %v1962_v33  ;;  %v738_v33 = vshll.u32 %v5628_v48, 16 }
  0x2f   : > { %v725_v29 = vsel %vm713_vm5, %v720_v21, %v724_v22  ;;  %v728_v37 = vor.u32 %v726_v27, %v724_v22  ;;  %v5706_v21 = vld [vmem:[%s5460_s27 + $0x70] sm:$0xff]   ;;  %v1148_v22 = vrot.slane %v5648_v39, 1  ;;  %v2359_v27 = vsel %vm2338_vm4, %v2356_v45, %v2358_v49  ;;  %v5747_v45 = vld [vmem:[%s5460_s27 + $0x60] sm:$0xff]  }
  0x30   : > { %v2364_v40 = vrot.slane %v5706_v21, 2 }
  0x31   : > { %v5721_v31 = vsel %vm1138_vm6, %v1146_v19, %v1148_v22 }
  0x33   : > { %4640 = vmatmul.mubr.msk.bf16.gmra.mrb[16].mxu1 %vm306_vm2, %v5318_v36  ;;  %v2351_v36 = vsel %vm2338_vm4, %v2348_v11, %v2350_v26  ;;  %v4220_v11 = vld [vmem:[%s6450_s1 + $0x6] sm:$0x3]  ;;  %v1152_v26 = vrot.slane %v5672_v57, 1 }
  0x34   : > { %4643 = vmatprep.mubr.msk.bf16.mxu1 %vm306_vm2, %v5320_v38  ;;  %v740_v38 = vrot.slane %v738_v33, 1 }
  0x35   : > { %4788 = vmatmul.mubr.msk.bf16.gmra.mrb[12].mxu0 %vm306_vm2, %v1971_v44  ;;  %v733_v44 = vsel %vm713_vm5, %v728_v37, %v732_v35 }
  0x36   : > { %4791 = vmatprep.mubr.msk.bf16.mxu0 %vm306_vm2, %v1980_v47  ;;  %v741_v47 = vsel %vm713_vm5, %v736_v1, %v740_v38  ;;  %v744_v15 = vor.u32 %v742_v43, %v740_v38  ;;  %v5737_v38 = vld [vmem:[%s5460_s27 + $0x58] sm:$0xff]  }
  0x3b   : > { %4644 = vmatmul.mubr.msk.bf16.gmra.mrb[20].mxu1 %vm306_vm2, %v5322_v51  ;;  %v750_v51 = vshrl.u32 %v5641_v34, 16 }
  0x3c   : > { %4647 = vmatprep.mubr.msk.bf16.mxu1 %vm306_vm2, %v5324_v53  ;;  %v5665_v53 = vld [vmem:[%s5460_s27 + $0x68] sm:$0xff]  }
  0x3d   : > { %4792 = vmatmul.mubr.msk.bf16.gmra.mrb[16].mxu0 %vm306_vm2, %v1989_v56  ;;  %v1140_v56 = vrot.slane %v5606_v3, 1  ;;  %v752_v63 = vor.u32 %v750_v51, %v748_v55  ;;  %v2362_v3 = vrot.slane %v5665_v53, 2 }
  0x3e   : > { %4813 = vmatprep.mubr.msk.bf16.mxu0 %vm306_vm2, %v2341_v16  ;;  %v2355_v16 = vsel %vm2338_vm4, %v2352_v28, %v2354_v42 }
  0x43   : > { %4648 = vmatmul.mubr.msk.bf16.gmra.mrb[24].mxu1 %vm306_vm2, %v5325_v18  ;;  %v2360_v18 = vrot.slane %v5658_v46, 2 }
  0x44   : > { %4651 = vmatprep.mubr.msk.bf16.mxu1 %vm306_vm2, %v5326_v61  ;;  %v4201_v61 = vcombine.low %v1132_v60, %v5589_v59  ;;  %v758_v59 = vshrl.u32 %v5648_v39, 16  ;;  %v1162_v60 = vrot.slane %v5747_v45, 1 }
  0x45   : > { %4814 = vmatmul.mubr.msk.bf16.vlgmr.msra.gmra.mrb[0].mxu0 %vm306_vm2, %v2343_v2  ;;  %v762_v2 = vshll.u32 %v5338_v54, 16  ;;  %v2361_v1 = vsel %vm2338_vm4, %v2358_v49, %v2360_v18  ;;  %v1160_v49 = vrot.slane %v5737_v38, 1 }
  0x46   : > { %4850 = vmatpush3.bf16.msra.mxu0 %v5516_v50  ;;  %4817 = vmatprep.mubr.msk.bf16.mxu0 %vm306_vm2, %v2345_v24  ;;  %v2347_v50 = vsel %vm2338_vm4, %v2344_v62, %v2346_v7  ;;  %v1142_v62 = vrot.slane %v5622_v20, 1  ;;  %v1144_v24 = vrot.slane %v5628_v48, 1  ;;  %v1139_v5 = vrot.slane %v4201_v61, 1  ;;  %v5770_v61 = vld [vmem:[%s5460_s27 + $0x78] sm:$0xff]  }
  0x47   : > { %4887 = vmatprep.subr.bf16.mxu0 %v5609_v30  ;;  %v770_v7 = vshll.u32 %v5672_v57, 16  ;;  %v5702_v20 = vand.u32 %v4220_v11, %v5434_v4  ;;  %v1150_v48 = vrot.slane %v5338_v54, 1  ;;  %v760_v34 = vor.u32 %v758_v59, %v756_v0  ;;  %v5792_v11 = vld [vmem:[%s5460_s27 + $0x78] sm:$0xff]  }
  0x48   : > { %v5698_v13 = vsel %vm1138_vm6, %v1139_v5, %v1140_v56  ;;  %v5711_v25 = vsel %vm1138_vm6, %v1144_v24, %v1146_v19  ;;  %v774_v54 = vshrl.u32 %v5672_v57, 16  ;;  %v2365_v5 = vsel %vm2338_vm4, %v2362_v3, %v2364_v40 }
  0x49   : > { %v772_v28 = vrot.slane %v770_v7, 1  ;;  %v5724_v33 = vsel %vm1138_vm6, %v1148_v22, %v1150_v48  ;;  %v5731_v37 = vsel %vm1138_vm6, %v1150_v48, %v1152_v26  ;;  %v2366_v19 = vrot.slane %v5770_v61, 2  ;;  %v5805_v22 = vld [vmem:[%s5460_s27 + $0x80] sm:$0xff]  }
  0x4b   : > { %4652 = vmatmul.mubr.msk.bf16.gmra.mrb[28].mxu1 %vm306_vm2, %v5327_v6  ;;  %v5684_v6 = vsel %vm1138_vm6, %v1140_v56, %v1142_v62 }
  0x4c   : > { %4655 = vmatprep.mubr.msk.bf16.mxu1 %vm306_vm2, %v5328_v9  ;;  %v5691_v9 = vsel %vm1138_vm6, %v1142_v62, %v1144_v24  ;;  %v5773_v62 = vsel %vm1138_vm6, %v1160_v49, %v1162_v60 }
  0x4d   : > { %4818 = vmatmul.mubr.msk.bf16.gmra.mrb[4].mxu0 %vm306_vm2, %v2347_v50  ;;  %v757_v50 = vsel %vm713_vm5, %v752_v63, %v756_v0  ;;  %v2363_v63 = vsel %vm2338_vm4, %v2360_v18, %v2362_v3  ;;  %v776_v0 = vor.u32 %v774_v54, %v772_v28 }
  0x4e   : > { %4821 = vmatprep.mubr.msk.bf16.mxu0 %vm306_vm2, %v2349_v41  ;;  %v764_v41 = vrot.slane %v762_v2, 1  ;;  %v5782_v2 = vld [vmem:[%s5460_s27 + $0x70] sm:$0xff]  }
  0x50   : > { %v768_v35 = vor.u32 %v766_v12, %v764_v41  ;;  %v765_v51 = vsel %vm713_vm5, %v760_v34, %v764_v41  ;;  %v1166_v12 = vrot.slane %v5782_v2, 1  ;;  %v802_v34 = vshll.u32 %v5737_v38, 16 }
  0x52   : > { %v773_v10 = vsel %vm713_vm5, %v768_v35, %v772_v28  ;;  %v5816_v35 = vld [vmem:[%s5460_s27 + $0x88] sm:$0xff]  }
  0x53   : > { %4656 = vmatmul.mubr.msk.bf16.gmra.mrb[32].mxu1 %vm306_vm2, %v5329_v23  ;;  %v5342_v23 = vld [vmem:[%s5460_s27 + $0x40] sm:$0xff]  }
  0x54   : > { %4661 = vmatprep.mubr.msk.bf16.mxu1 %vm306_vm2, %v725_v29  ;;  %v5718_v29 = vld [vmem:[%s5460_s27 + $0x48] sm:$0xff]   ;;  %v778_v42 = vshll.u32 %v5342_v23, 16  ;;  %v782_v56 = vshrl.u32 %v5342_v23, 16 }
  0x55   : > { %4822 = vmatmul.mubr.msk.bf16.gmra.mrb[8].mxu0 %vm306_vm2, %v2351_v36  ;;  %v5728_v36 = vld [vmem:[%s5460_s27 + $0x50] sm:$0xff]   ;;  %v1156_v39 = vrot.slane %v5718_v29, 1  ;;  %v790_v41 = vshrl.u32 %v5718_v29, 16 }
  0x56   : > { %4825 = vmatprep.mubr.msk.bf16.mxu0 %vm306_vm2, %v2353_v58  ;;  %v1154_v58 = vrot.slane %v5342_v23, 1  ;;  %v780_v57 = vrot.slane %v778_v42, 1  ;;  %v1168_v23 = vrot.slane %v5792_v11, 1  ;;  %v798_v28 = vshrl.u32 %v5728_v36, 16 }
  0x57   : > { %v2367_v42 = vsel %vm2338_vm4, %v2364_v40, %v2366_v19 }
  0x58   : > { %v5742_v43 = vsel %vm1138_vm6, %v1152_v26, %v1154_v58  ;;  %v784_v59 = vor.u32 %v782_v56, %v780_v57  ;;  %v781_v3 = vsel %vm713_vm5, %v776_v0, %v780_v57 }
  0x5b   : > { %4662 = vmatmul.mubr.msk.bf16.vlgmr.msra.gmra.mrb[0].mxu1 %vm306_vm2, %v733_v44  ;;  %v1158_v44 = vrot.slane %v5728_v36, 1 }
  0x5c   : > { %4665 = vmatprep.mubr.msk.bf16.mxu1 %vm306_vm2, %v741_v47  ;;  %4698 = vmatpush3.bf16.msra.mxu1 %v5467_v14  ;;  %v749_v14 = vsel %vm713_vm5, %v744_v15, %v748_v55  ;;  %v5750_v47 = vsel %vm1138_vm6, %v1154_v58, %v1156_v39  ;;  %v1170_v58 = vrot.slane %v5805_v22, 1 }
  0x5d   : > { %4826 = vmatmul.mubr.msk.bf16.gmra.mrb[12].mxu0 %vm306_vm2, %v2355_v16  ;;  %4735 = vmatprep.subr.bf16.mxu1 %v5702_v20  ;;  %v5758_v55 = vsel %vm1138_vm6, %v1156_v39, %v1158_v44  ;;  %v786_v16 = vshll.u32 %v5718_v29, 16  ;;  %v5762_v15 = vsel %vm1138_vm6, %v1158_v44, %v1160_v49  ;;  %v5819_v29 = vsel %vm1138_vm6, %v1166_v12, %v1168_v23  ;;  %v5832_v49 = vld [vmem:[%s5460_s27 + $0x90] ss:$0 sps:$4 sm:$0x11]  }
  0x5e   : > { %4829 = vmatprep.mubr.msk.bf16.mxu0 %vm306_vm2, %v2357_v32  ;;  %v5766_v32 = vld [vmem:[%s5460_s27 + $0x68] sm:$0xff]  }
  0x5f   : > { %v1164_v24 = vrot.slane %v5766_v32, 1  ;;  %v788_v7 = vrot.slane %v786_v16, 1  ;;  %v804_v16 = vrot.slane %v802_v34, 1 }
  0x61   : > { %v5795_v18 = vsel %vm1138_vm6, %v1162_v60, %v1164_v24  ;;  %v5808_v48 = vsel %vm1138_vm6, %v1164_v24, %v1166_v12  ;;  %v792_v44 = vor.u32 %v790_v41, %v788_v7  ;;  %v1174_v60 = vrot.slane %v5832_v49, 1  ;;  %v2646_v12 = vld [vmem:[%s5460_s27 + $0x10] sm:$0xc] }
  0x63   : > { %4666 = vmatmul.mubr.msk.bf16.gmra.mrb[4].mxu1 %vm306_vm2, %v749_v14  ;;  %v5789_v14 = vld [vmem:[%s5460_s27 + $0x80] sm:$0xff]  }
  0x64   : > { %4669 = vmatprep.mubr.msk.bf16.mxu1 %vm306_vm2, %v757_v50  ;;  %v794_v50 = vshll.u32 %v5728_v36, 16  ;;  %v2368_v26 = vrot.slane %v5789_v14, 2  ;;  %v5829_v36 = vld [vmem:[%s5460_s27 + $0x90] sm:$0xff]  }
  0x65   : > { %4830 = vmatmul.mubr.msk.bf16.gmra.mrb[16].mxu0 %vm306_vm2, %v2359_v27  ;;  %v789_v27 = vsel %vm713_vm5, %v784_v59, %v788_v7  ;;  %v2372_v24 = vrot.slane %v5829_v36, 2 }
  0x66   : > { %4833 = vmatprep.mubr.msk.bf16.mxu0 %vm306_vm2, %v2361_v1  ;;  %v5824_v1 = vld [vmem:[%s5460_s27 + $0x88] sm:$0xff]   ;;  %v796_v39 = vrot.slane %v794_v50, 1  ;;  %v2369_v54 = vsel %vm2338_vm4, %v2366_v19, %v2368_v26  ;;  %v5856_v19 = vld [vmem:[%s5460_s27 + $0x14] sm:$0xf]  ;;  %v814_v50 = vshrl.u32 %v5747_v45, 16 }
  0x67   : > { %v2370_v57 = vrot.slane %v5824_v1, 2 }
  0x68   : > { %v800_v56 = vor.u32 %v798_v28, %v796_v39  ;;  %v797_v0 = vsel %vm713_vm5, %v792_v44, %v796_v39  ;;  %v5867_v28 = vcombine.low %v2646_v12, %v5856_v19  ;;  %v5892_v12 = vld [vmem:[%s5460_s27 + $0x28] sm:$0xff]  }
  0x69   : > { %v2373_v34 = vsel %vm2338_vm4, %v2370_v57, %v2372_v24 }
  0x6a   : > { %v805_v7 = vsel %vm713_vm5, %v800_v56, %v804_v16 }
  0x6b   : > { %4670 = vmatmul.mubr.msk.bf16.gmra.mrb[8].mxu1 %vm306_vm2, %v765_v51  ;;  %v5835_v51 = vsel %vm1138_vm6, %v1168_v23, %v1170_v58  ;;  %v2371_v23 = vsel %vm2338_vm4, %v2368_v26, %v2370_v57  ;;  %v834_v57 = vshll.u32 %v5792_v11, 16 }
  0x6c   : > { %4673 = vmatprep.mubr.msk.bf16.mxu1 %vm306_vm2, %v773_v10  ;;  %v1172_v10 = vrot.slane %v5816_v35, 1 }
  0x6d   : > { %4834 = vmatmul.mubr.msk.bf16.gmra.mrb[20].mxu0 %vm306_vm2, %v2363_v63  ;;  %v810_v63 = vshll.u32 %v5747_v45, 16 }
  0x6e   : > { %4837 = vmatprep.mubr.msk.bf16.mxu0 %vm306_vm2, %v2365_v5  ;;  %v5840_v40 = vsel %vm1138_vm6, %v1170_v58, %v1172_v10  ;;  %v806_v5 = vshrl.u32 %v5737_v38, 16  ;;  %v5851_v59 = vsel %vm1138_vm6, %v1172_v10, %v1174_v60  ;;  %v5864_v38 = vld [vmem:[%s5460_s27 + $0x98] ss:$0 sps:$4 sm:$0x33]   ;;  %v2778_v10 = vrot.slane %v5867_v28, 2 }
  0x6f   : > { %v812_v41 = vrot.slane %v810_v63, 1  ;;  %v5871_v58 = vld [vmem:[%s5460_s27 + $0x18] sm:$0xff]   ;;  %v2374_v26 = vrot.slane %v5864_v38, 2  ;;  %v830_v60 = vshrl.u32 %v5782_v2, 16 }
  0x70   : > { %v2779_v56 = vrot.slane %v5871_v58, 2 }
  0x71   : > { %v816_v45 = vor.u32 %v814_v50, %v812_v41 }
  0x73   : > { %4674 = vmatmul.mubr.msk.bf16.gmra.mrb[12].mxu1 %vm306_vm2, %v781_v3  ;;  %v818_v3 = vshll.u32 %v5766_v32, 16 }
  0x74   : > { %4677 = vmatprep.mubr.msk.bf16.mxu1 %vm306_vm2, %v789_v27  ;;  %v808_v27 = vor.u32 %v806_v5, %v804_v16  ;;  %v5888_v5 = vld [vmem:[%s5460_s27 + $0x20] sm:$0xff]  }
  0x75   : > { %4838 = vmatmul.mubr.msk.bf16.gmra.mrb[24].mxu0 %vm306_vm2, %v2367_v42  ;;  %v820_v39 = vrot.slane %v818_v3, 1  ;;  %v826_v42 = vshll.u32 %v5782_v2, 16  ;;  %v836_v3 = vrot.slane %v834_v57, 1  ;;  %v842_v2 = vshll.u32 %v5805_v22, 16 }
  0x76   : > { %4841 = vmatprep.mubr.msk.bf16.mxu0 %vm306_vm2, %v2369_v54  ;;  %v813_v44 = vsel %vm713_vm5, %v808_v27, %v812_v41  ;;  %v822_v54 = vshrl.u32 %v5766_v32, 16  ;;  %v2780_v32 = vsel %vm2338_vm4, %v2778_v10, %v2779_v56  ;;  %v2783_v27 = vrot.slane %v5892_v12, 2 }
  0x77   : > { %v821_v16 = vsel %vm713_vm5, %v816_v45, %v820_v39  ;;  %v828_v63 = vrot.slane %v826_v42, 1  ;;  %v846_v45 = vshrl.u32 %v5805_v22, 16  ;;  %v4356_v42 = vld [vmem:[%s6450_s1 + $0x10] sm:$0x3] }
  0x78   : > { %v5918_v57 = vand.u32 %v4356_v42, %v5434_v4 }
  0x79   : > { %v832_v50 = vor.u32 %v830_v60, %v828_v63 }
  0x7b   : > { %4678 = vmatmul.mubr.msk.bf16.gmra.mrb[16].mxu1 %vm306_vm2, %v797_v0  ;;  %v2375_v0 = vsel %vm2338_vm4, %v2372_v24, %v2374_v26  ;;  %v2781_v24 = vrot.slane %v5888_v5, 2  ;;  %v844_v26 = vrot.slane %v842_v2, 1  ;;  %v5938_v2 = vld [vmem:[%s5460_s27 + $0x48] sm:$0xff]  }
  0x7c   : > { %4681 = vmatprep.mubr.msk.bf16.mxu1 %vm306_vm2, %v805_v7  ;;  %v824_v7 = vor.u32 %v822_v54, %v820_v39  ;;  %v850_v39 = vshll.u32 %v5816_v35, 16 }
  0x7d   : > { %4842 = vmatmul.mubr.msk.bf16.gmra.mrb[28].mxu0 %vm306_vm2, %v2371_v23  ;;  %v838_v23 = vshrl.u32 %v5792_v11, 16  ;;  %v5911_v11 = vld [vmem:[%s5460_s27 + $0x30] sm:$0xff]   ;;  %v2784_v54 = vsel %vm2338_vm4, %v2781_v24, %v2783_v27  ;;  %v848_v22 = vor.u32 %v846_v45, %v844_v26 }
  0x7e   : > { %4845 = vmatprep.mubr.msk.bf16.mxu0 %vm306_vm2, %v2373_v34  ;;  %v829_v41 = vsel %vm713_vm5, %v824_v7, %v828_v63  ;;  %v837_v34 = vsel %vm713_vm5, %v832_v50, %v836_v3  ;;  %v852_v60 = vrot.slane %v850_v39, 1  ;;  %v858_v7 = vshll.u32 %v5832_v49, 16  ;;  %v5934_v50 = vld [vmem:[%s5460_s27 + $0x40] sm:$0xff]   ;;  %v5954_v39 = vld [vmem:[%s5460_s27 + $0x58] sm:$0xff]  }
  0x7f   : > { %v840_v10 = vor.u32 %v838_v23, %v836_v3  ;;  %v2791_v23 = vrot.slane %v5938_v2, 2 }
  0x80   : > { %v853_v4 = vsel %vm713_vm5, %v848_v22, %v852_v60 }
  0x81   : > { %v845_v63 = vsel %vm713_vm5, %v840_v10, %v844_v26  ;;  %v2795_v26 = vrot.slane %v5954_v39, 2 }
  0x83   : > { %4682 = vmatmul.mubr.msk.bf16.gmra.mrb[20].mxu1 %vm306_vm2, %v813_v44  ;;  %v2782_v44 = vsel %vm2338_vm4, %v2779_v56, %v2781_v24  ;;  %v2785_v56 = vrot.slane %v5911_v11, 2  ;;  %v2789_v24 = vrot.slane %v5934_v50, 2 }
  0x84   : > { %4685 = vmatprep.mubr.msk.bf16.mxu1 %vm306_vm2, %v821_v16  ;;  %v5915_v16 = vld [vmem:[%s5460_s27 + $0x38] sm:$0xff]  }
  0x85   : > { %4846 = vmatmul.mubr.msk.bf16.gmra.mrb[32].mxu0 %vm306_vm2, %v2375_v0  ;;  %v854_v0 = vshrl.u32 %v5816_v35, 16  ;;  %v860_v35 = vrot.slane %v858_v7, 1  ;;  %v2792_v45 = vsel %vm2338_vm4, %v2789_v24, %v2791_v23 }
  0x86   : > { %4851 = vmatprep.mubr.msk.bf16.mxu0 %vm306_vm2, %v2780_v32  ;;  %v2787_v32 = vrot.slane %v5915_v16, 2 }
  0x87   : > { %v856_v3 = vor.u32 %v854_v0, %v852_v60  ;;  %v6000_v0 = vld [vmem:[%s5460_s27 + $0x80] sm:$0xff]  }
  0x88   : > { %v2788_v49 = vsel %vm2338_vm4, %v2785_v56, %v2787_v32 }
  0x8b   : > { %4686 = vmatmul.mubr.msk.bf16.gmra.mrb[24].mxu1 %vm306_vm2, %v829_v41  ;;  %v861_v41 = vsel %vm713_vm5, %v856_v3, %v860_v35  ;;  %v6019_v3 = vld [vmem:[%s5460_s27 + $0x98] sm:$0xff]  }
  0x8c   : > { %4689 = vmatprep.mubr.msk.bf16.mxu1 %vm306_vm2, %v837_v34  ;;  %v5950_v34 = vld [vmem:[%s5460_s27 + $0x50] sm:$0xff]  }
  0x8d   : > { %4852 = vmatmul.mubr.msk.bf16.vlgmr.msra.gmra.mrb[0].mxu0 %vm306_vm2, %v2782_v44  ;;  %v2793_v42 = vrot.slane %v5950_v34, 2  ;;  %v5966_v44 = vld [vmem:[%s5460_s27 + $0x60] sm:$0xff]  }
  0x8e   : > { %4888 = vmatpush3.bf16.msra.mxu0 %v5609_v30  ;;  %4855 = vmatprep.mubr.msk.bf16.mxu0 %vm306_vm2, %v2784_v54  ;;  %v2786_v30 = vsel %vm2338_vm4, %v2783_v27, %v2785_v56  ;;  %v2790_v27 = vsel %vm2338_vm4, %v2787_v32, %v2789_v24  ;;  %v5971_v54 = vld [vmem:[%s5460_s27 + $0x68] sm:$0xff]   ;;  %v5988_v56 = vld [vmem:[%s5460_s27 + $0x78] sm:$0xff]   ;;  %v3093_v24 = vshrl.u32 %v5867_v28, 16 }
  0x8f   : > { %4925 = vmatprep.subr.bf16.mxu0 %v5918_v57  ;;  %v2796_v10 = vsel %vm2338_vm4, %v2793_v42, %v2795_v26  ;;  %v2799_v22 = vrot.slane %v5971_v54, 2  ;;  %v6004_v32 = vld [vmem:[%s5460_s27 + $0x88] sm:$0xff]  }
  0x93   : > { %4690 = vmatmul.mubr.msk.bf16.gmra.mrb[28].mxu1 %vm306_vm2, %v845_v63 }
  0x94   : > { %4693 = vmatprep.mubr.msk.bf16.mxu1 %vm306_vm2, %v853_v4  ;;  %v2805_v4 = vrot.slane %v6000_v0, 2 }
  0x95   : > { %4856 = vmatmul.mubr.msk.bf16.gmra.mrb[4].mxu0 %vm306_vm2, %v2786_v30  ;;  %v2807_v30 = vrot.slane %v6004_v32, 2 }
  0x96   : > { %4859 = vmatprep.mubr.msk.bf16.mxu0 %vm306_vm2, %v2788_v49 }
  0x97   : > { %v2808_v35 = vsel %vm2338_vm4, %v2805_v4, %v2807_v30 }
  0x9b   : > { %4694 = vmatmul.mubr.msk.bf16.gmra.mrb[32].mxu1 %vm306_vm2, %v861_v41  ;;  %v3096_v41 = vshll.u32 %v5867_v28, 16 }
  0x9c   : > { %4699 = vmatprep.mubr.msk.bf16.mxu1 %vm306_vm2, %v5698_v13  ;;  %v2794_v13 = vsel %vm2338_vm4, %v2791_v23, %v2793_v42  ;;  %v3104_v23 = vshll.u32 %v5871_v58, 16  ;;  %v5376_v42 = vld [vmem:[%s5460_s27 + $0xa0] ss:$0 sps:$4 sm:$0x33]  }
  0x9d   : > { %4860 = vmatmul.mubr.msk.bf16.gmra.mrb[8].mxu0 %vm306_vm2, %v2790_v27  ;;  %v2813_v28 = vrot.slane %v5376_v42, 2 }
  0x9e   : > { %4863 = vmatprep.mubr.msk.bf16.mxu0 %vm306_vm2, %v2792_v45 }
  0xa3   : > { %4700 = vmatmul.mubr.msk.bf16.vlgmr.msra.gmra.mrb[0].mxu1 %vm306_vm2, %v5684_v6  ;;  %v2797_v6 = vrot.slane %v5966_v44, 2 }
  0xa4   : > { %4703 = vmatprep.mubr.msk.bf16.mxu1 %vm306_vm2, %v5691_v9  ;;  %4736 = vmatpush3.bf16.msra.mxu1 %v5702_v20  ;;  %v5984_v20 = vld [vmem:[%s5460_s27 + $0x70] sm:$0xff]  }
  0xa5   : > { %4963 = vmatprep.subr.bf16.mxu1 %v5446_v8  ;;  %4864 = vmatmul.mubr.msk.bf16.gmra.mrb[12].mxu0 %vm306_vm2, %v2794_v13  ;;  %v2798_v9 = vsel %vm2338_vm4, %v2795_v26, %v2797_v6  ;;  %v2800_v60 = vsel %vm2338_vm4, %v2797_v6, %v2799_v22  ;;  %v2801_v63 = vrot.slane %v5984_v20, 2  ;;  %v3095_v26 = vrot.slane %v3093_v24, 2 }
  0xa6   : > { %4867 = vmatprep.mubr.msk.bf16.mxu0 %vm306_vm2, %v2796_v10  ;;  %v3098_v13 = vrot.slane %v3096_v41, 3  ;;  %v3106_v6 = vrot.slane %v3104_v23, 3 }
  0xab   : > { %4704 = vmatmul.mubr.msk.bf16.gmra.mrb[4].mxu1 %vm306_vm2, %v5711_v25  ;;  %v2803_v25 = vrot.slane %v5988_v56, 2 }
  0xac   : > { %4707 = vmatprep.mubr.msk.bf16.mxu1 %vm306_vm2, %v5721_v31  ;;  %v2802_v31 = vsel %vm2338_vm4, %v2799_v22, %v2801_v63  ;;  %v3110_v22 = vshrl.u32 %v5888_v5, 16 }
  0xad   : > { %4868 = vmatmul.mubr.msk.bf16.gmra.mrb[16].mxu0 %vm306_vm2, %v2798_v9  ;;  %v2804_v7 = vsel %vm2338_vm4, %v2801_v63, %v2803_v25  ;;  %v3099_v9 = vor.u32 %v3098_v13, %v3095_v26  ;;  %v3119_v63 = vshrl.u32 %v5892_v12, 16  ;;  %v3149_v13 = vshll.u32 %v5934_v50, 16 }
  0xae   : > { %4871 = vmatprep.mubr.msk.bf16.mxu0 %vm306_vm2, %v2800_v60 }
  0xb3   : > { %4708 = vmatmul.mubr.msk.bf16.gmra.mrb[8].mxu1 %vm306_vm2, %v5724_v33  ;;  %v2806_v33 = vsel %vm2338_vm4, %v2803_v25, %v2805_v4 }
  0xb4   : > { %4711 = vmatprep.mubr.msk.bf16.mxu1 %vm306_vm2, %v5731_v37  ;;  %v6016_v37 = vld [vmem:[%s5460_s27 + $0x90] sm:$0xff]  }
  0xb5   : > { %4872 = vmatmul.mubr.msk.bf16.gmra.mrb[20].mxu0 %vm306_vm2, %v2802_v31  ;;  %v2809_v49 = vrot.slane %v6016_v37, 2  ;;  %v3112_v31 = vrot.slane %v3110_v22, 2  ;;  %v3151_v22 = vrot.slane %v3149_v13, 3  ;;  %v3191_v13 = vshrl.u32 %v5971_v54, 16 }
  0xb6   : > { %4875 = vmatprep.mubr.msk.bf16.mxu0 %vm306_vm2, %v2804_v7 }
  0xb7   : > { %v2810_v27 = vsel %vm2338_vm4, %v2807_v30, %v2809_v49  ;;  %v3121_v30 = vrot.slane %v3119_v63, 2  ;;  %v1578_v63 = vrot.slane %v5476_v17, 1  ;;  %v3176_v17 = vshll.u32 %v5954_v39, 16 }
  0xbb   : > { %4712 = vmatmul.mubr.msk.bf16.gmra.mrb[12].mxu1 %vm306_vm2, %v5742_v43  ;;  %v2811_v43 = vrot.slane %v6019_v3, 2 }
  0xbc   : > { %4715 = vmatprep.mubr.msk.bf16.mxu1 %vm306_vm2, %v5750_v47  ;;  %v3101_v47 = vshrl.u32 %v5871_v58, 16 }
  0xbd   : > { %4876 = vmatmul.mubr.msk.bf16.gmra.mrb[24].mxu0 %vm306_vm2, %v2806_v33  ;;  %v2812_v45 = vsel %vm2338_vm4, %v2809_v49, %v2811_v43  ;;  %v2814_v25 = vsel %vm2338_vm4, %v2811_v43, %v2813_v28  ;;  %v3128_v49 = vshrl.u32 %v5911_v11, 16  ;;  %v3137_v43 = vshrl.u32 %v5915_v16, 16 }
  0xbe   : > { %4879 = vmatprep.mubr.msk.bf16.mxu0 %vm306_vm2, %v2808_v35  ;;  %v3103_v10 = vrot.slane %v3101_v47, 2 }
  0xbf   : > { %v3130_v47 = vrot.slane %v3128_v49, 2 }
  0xc0   : > { %v3107_v60 = vor.u32 %v3106_v6, %v3103_v10  ;;  %v3158_v6 = vshll.u32 %v5938_v2, 16 }
  0xc2   : > { %v3108_v4 = vsel %vm3091_vm7, %v3099_v9, %v3107_v60 }
  0xc3   : > { %4716 = vmatmul.mubr.msk.bf16.gmra.mrb[16].mxu1 %vm306_vm2, %v5758_v55  ;;  %v3113_v55 = vshll.u32 %v5888_v5, 16 }
  0xc4   : > { %4719 = vmatprep.mubr.msk.bf16.mxu1 %vm306_vm2, %v5762_v15  ;;  %v3122_v15 = vshll.u32 %v5892_v12, 16 }
  0xc5   : > { %4880 = vmatmul.mubr.msk.bf16.gmra.mrb[28].mxu0 %vm306_vm2, %v2810_v27  ;;  %v3115_v7 = vrot.slane %v3113_v55, 3 }
  0xc6   : > { %4883 = vmatprep.mubr.msk.bf16.mxu0 %vm306_vm2, %v2812_v45  ;;  %v3124_v33 = vrot.slane %v3122_v15, 3  ;;  %v3139_v45 = vrot.slane %v3137_v43, 2  ;;  %v5380_v15 = vld [vmem:[%s5460_s27 + $0x10] sm:$0xff]  }
  0xc7   : > { %v3116_v35 = vor.u32 %v3115_v7, %v3112_v31  ;;  %v3164_v31 = vshrl.u32 %v5950_v34, 16 }
  0xc8   : > { %v3125_v24 = vor.u32 %v3124_v33, %v3121_v30  ;;  %v3173_v30 = vshrl.u32 %v5954_v39, 16 }
  0xc9   : > { %v3117_v41 = vsel %vm3091_vm7, %v3107_v60, %v3116_v35  ;;  %v3160_v60 = vrot.slane %v3158_v6, 3 }
  0xca   : > { %v3126_v27 = vsel %vm3091_vm7, %v3116_v35, %v3125_v24  ;;  %v3166_v35 = vrot.slane %v3164_v31, 2  ;;  %v3200_v31 = vshrl.u32 %v5984_v20, 16 }
  0xcb   : > { %4720 = vmatmul.mubr.msk.bf16.gmra.mrb[20].mxu1 %vm306_vm2, %v5773_v62  ;;  %v3131_v62 = vshll.u32 %v5911_v11, 16 }
  0xcc   : > { %4723 = vmatprep.mubr.msk.bf16.mxu1 %vm306_vm2, %v5795_v18  ;;  %v3140_v18 = vshll.u32 %v5915_v16, 16 }
  0xcd   : > { %4884 = vmatmul.mubr.msk.bf16.gmra.mrb[32].mxu0 %vm306_vm2, %v2814_v25  ;;  %v3133_v23 = vrot.slane %v3131_v62, 3  ;;  %v1579_v25 = vrot.slane %v5380_v15, 1  ;;  %v5381_v62 = vld [vmem:[%s5460_s27 + $0x18] sm:$0xff]  }
  0xce   : > { %4889 = vmatprep.mubr.msk.bf16.mxu0 %vm306_vm2, %v3108_v4  ;;  %v3142_v42 = vrot.slane %v3140_v18, 3  ;;  %v3175_v18 = vrot.slane %v3173_v30, 2  ;;  %v3212_v30 = vshll.u32 %v5988_v56, 16 }
  0xcf   : > { %v3134_v26 = vor.u32 %v3133_v23, %v3130_v47  ;;  %v1580_v4 = vsel %vm1138_vm6, %v1578_v63, %v1579_v25  ;;  %v5382_v47 = vld [vmem:[%s5460_s27 + $0x20] sm:$0xff]   ;;  %v5384_v63 = vld [vmem:[%s5460_s27 + $0x30] sm:$0xff]  }
  0xd0   : > { %v3143_v10 = vor.u32 %v3142_v42, %v3139_v45  ;;  %v1583_v23 = vrot.slane %v5382_v47, 1  ;;  %v3182_v45 = vshrl.u32 %v5966_v44, 16  ;;  %v3185_v42 = vshll.u32 %v5966_v44, 16 }
  0xd1   : > { %v3135_v28 = vsel %vm3091_vm7, %v3125_v24, %v3134_v26  ;;  %v1581_v24 = vrot.slane %v5381_v62, 1  ;;  %v1587_v15 = vrot.slane %v5384_v63, 1 }
  0xd2   : > { %v3144_v9 = vsel %vm3091_vm7, %v3134_v26, %v3143_v10  ;;  %v3184_v6 = vrot.slane %v3182_v45, 2  ;;  %v3221_v45 = vshll.u32 %v6000_v0, 16 }
  0xd3   : > { %4724 = vmatmul.mubr.msk.bf16.gmra.mrb[24].mxu1 %vm306_vm2, %v5808_v48  ;;  %v3146_v48 = vshrl.u32 %v5934_v50, 16 }
  0xd4   : > { %4727 = vmatprep.mubr.msk.bf16.mxu1 %vm306_vm2, %v5819_v29  ;;  %v3155_v29 = vshrl.u32 %v5938_v2, 16 }
  0xd5   : > { %4890 = vmatmul.mubr.msk.bf16.vlgmr.msra.gmra.mrb[0].mxu0 %vm306_vm2, %v3117_v41  ;;  %v3178_v41 = vrot.slane %v3176_v17, 3 }
  0xd6   : > { %4926 = vmatpush3.bf16.msra.mxu0 %v5918_v57  ;;  %4893 = vmatprep.mubr.msk.bf16.mxu0 %vm306_vm2, %v3126_v27  ;;  %v3148_v57 = vrot.slane %v3146_v48, 2  ;;  %v3157_v55 = vrot.slane %v3155_v29, 2  ;;  %v1582_v27 = vsel %vm1138_vm6, %v1579_v25, %v1581_v24  ;;  %v1584_v48 = vsel %vm1138_vm6, %v1581_v24, %v1583_v23 }
  0xd7   : > { %v3179_v26 = vor.u32 %v3178_v41, %v3175_v18  ;;  %v3194_v29 = vshll.u32 %v5971_v54, 16  ;;  %v3214_v18 = vrot.slane %v3212_v30, 3  ;;  %v5386_v41 = vld [vmem:[%s5460_s27 + $0x40] sm:$0xff]  }
  0xd8   : > { %v3161_v7 = vor.u32 %v3160_v60, %v3157_v55  ;;  %v1591_v47 = vrot.slane %v5386_v41, 1  ;;  %v1599_v41 = vrot.slane %v5658_v46, 1 }
  0xd9   : > { %v3196_v60 = vrot.slane %v3194_v29, 3 }
  0xdb   : > { %4728 = vmatmul.mubr.msk.bf16.gmra.mrb[28].mxu1 %vm306_vm2, %v5835_v51  ;;  %v3152_v51 = vor.u32 %v3151_v22, %v3148_v57  ;;  %v5383_v57 = vld [vmem:[%s5460_s27 + $0x28] sm:$0xff]  }
  0xdc   : > { %4731 = vmatprep.mubr.msk.bf16.mxu1 %vm306_vm2, %v5840_v40  ;;  %v3167_v40 = vshll.u32 %v5950_v34, 16  ;;  %v1585_v22 = vrot.slane %v5383_v57, 1 }
  0xdd   : > { %4894 = vmatmul.mubr.msk.bf16.gmra.mrb[4].mxu0 %vm306_vm2, %v3135_v28  ;;  %v3153_v33 = vsel %vm3091_vm7, %v3143_v10, %v3152_v51  ;;  %v3162_v43 = vsel %vm3091_vm7, %v3152_v51, %v3161_v7  ;;  %v3187_v28 = vrot.slane %v3185_v42, 3 }
  0xde   : > { %4897 = vmatprep.mubr.msk.bf16.mxu0 %vm306_vm2, %v3144_v9  ;;  %v3169_v49 = vrot.slane %v3167_v40, 3  ;;  %v3193_v9 = vrot.slane %v3191_v13, 2  ;;  %v1586_v51 = vsel %vm1138_vm6, %v1583_v23, %v1585_v22  ;;  %v3203_v40 = vshll.u32 %v5984_v20, 16 }
  0xdf   : > { %v3188_v25 = vor.u32 %v3187_v28, %v3184_v6  ;;  %v3230_v13 = vshll.u32 %v6004_v32, 16  ;;  %v3223_v6 = vrot.slane %v3221_v45, 3  ;;  %v5387_v28 = vld [vmem:[%s5460_s27 + $0x48] sm:$0xff]  }
  0xe0   : > { %v1593_v57 = vrot.slane %v5387_v28, 1 }
  0xe1   : > { %v3189_v17 = vsel %vm3091_vm7, %v3179_v26, %v3188_v25 }
  0xe3   : > { %4732 = vmatmul.mubr.msk.bf16.gmra.mrb[32].mxu1 %vm306_vm2, %v5851_v59  ;;  %v3170_v59 = vor.u32 %v3169_v49, %v3166_v35  ;;  %v3205_v35 = vrot.slane %v3203_v40, 3  ;;  %v5385_v49 = vld [vmem:[%s5460_s27 + $0x38] sm:$0xff]  }
  0xe4   : > { %4737 = vmatprep.mubr.msk.bf16.mxu1 %vm306_vm2, %v1580_v4  ;;  %v3209_v4 = vshrl.u32 %v5988_v56, 16  ;;  %v1589_v62 = vrot.slane %v5385_v49, 1 }
  0xe5   : > { %4898 = vmatmul.mubr.msk.bf16.gmra.mrb[8].mxu0 %vm306_vm2, %v3153_v33  ;;  %v3171_v10 = vsel %vm3091_vm7, %v3161_v7, %v3170_v59  ;;  %v3180_v55 = vsel %vm3091_vm7, %v3170_v59, %v3179_v26  ;;  %v1588_v7 = vsel %vm1138_vm6, %v1585_v22, %v1587_v15  ;;  %v3202_v33 = vrot.slane %v3200_v31, 2 }
  0xe6   : > { %4901 = vmatprep.mubr.msk.bf16.mxu0 %vm306_vm2, %v3162_v43  ;;  %v3211_v43 = vrot.slane %v3209_v4, 2  ;;  %v1590_v59 = vsel %vm1138_vm6, %v1587_v15, %v1589_v62  ;;  %v1592_v26 = vsel %vm1138_vm6, %v1589_v62, %v1591_v47  ;;  %v3239_v31 = vshll.u32 %v6016_v37, 16  ;;  %v6146_v62 = vld [vmem:[%s5460_s27 + $0xa0] ss:$0 sps:$4 sm:$0x77]  }
  0xe7   : > { %v3206_v23 = vor.u32 %v3205_v35, %v3202_v33  ;;  %v3248_v4 = vshll.u32 %v6019_v3, 16  ;;  %v5389_v35 = vld [vmem:[%s5460_s27 + $0x58] sm:$0xff]  }
  0xe8   : > { %v3215_v42 = vor.u32 %v3214_v18, %v3211_v43  ;;  %v3241_v33 = vrot.slane %v3239_v31, 3  ;;  %v1597_v49 = vrot.slane %v5389_v35, 1  ;;  %v3544_v31 = vrot.slane %v5892_v12, 3  ;;  %v5379_v35 = vld [vmem:[%s5460_s27 + $0x98] ss:$0 sps:$4 sm:$0x11]  }
  0xe9   : > { %v3250_v18 = vrot.slane %v3248_v4, 3  ;;  %v3546_v12 = vrot.slane %v5911_v11, 3 }
  0xea   : > { %v3216_v22 = vsel %vm3091_vm7, %v3206_v23, %v3215_v42 }
  0xeb   : > { %4738 = vmatmul.mubr.msk.bf16.vlgmr.msra.gmra.mrb[0].mxu1 %vm306_vm2, %v1582_v27  ;;  %v3218_v27 = vshrl.u32 %v6000_v0, 16 }
  0xec   : > { %4741 = vmatprep.mubr.msk.bf16.mxu1 %vm306_vm2, %v1584_v48  ;;  %4964 = vmatpush3.bf16.msra.mxu1 %v5446_v8  ;;  %v3197_v8 = vor.u32 %v3196_v60, %v3193_v9  ;;  %v3227_v48 = vshrl.u32 %v6004_v32, 16  ;;  %v3232_v9 = vrot.slane %v3230_v13, 3  ;;  %v5388_v60 = vld [vmem:[%s5460_s27 + $0x50] sm:$0xff]  }
  0xed   : > { %4902 = vmatmul.mubr.msk.bf16.gmra.mrb[12].mxu0 %vm306_vm2, %v3171_v10  ;;  %v3220_v10 = vrot.slane %v3218_v27, 2  ;;  %v1595_v63 = vrot.slane %v5388_v60, 1  ;;  %v3257_v27 = vshll.u32 %v6146_v62, 16  ;;  %v3540_v60 = vrot.slane %v5871_v58, 3 }
  0xee   : > { %4905 = vmatprep.mubr.msk.bf16.mxu0 %vm306_vm2, %v3180_v55  ;;  %v3198_v24 = vsel %vm3091_vm7, %v3188_v25, %v3197_v8  ;;  %v3207_v29 = vsel %vm3091_vm7, %v3197_v8, %v3206_v23  ;;  %v3229_v55 = vrot.slane %v3227_v48, 2  ;;  %v1594_v25 = vsel %vm1138_vm6, %v1591_v47, %v1593_v57 }
  0xef   : > { %v3224_v15 = vor.u32 %v3223_v6, %v3220_v10  ;;  %v1596_v8 = vsel %vm1138_vm6, %v1593_v57, %v1595_v63  ;;  %v1598_v23 = vsel %vm1138_vm6, %v1595_v63, %v1597_v49  ;;  %v1601_v10 = vrot.slane %v5665_v53, 1 }
  0xf0   : > { %v3233_v40 = vor.u32 %v3232_v9, %v3229_v55  ;;  %v1603_v57 = vrot.slane %v5706_v21, 1  ;;  %v3542_v58 = vrot.slane %v5888_v5, 3  ;;  %v1991_v5 = vshrl.u32 %v5658_v46, 16 }
  0xf1   : > { %v3225_v30 = vsel %vm3091_vm7, %v3215_v42, %v3224_v15  ;;  %v1600_v42 = vsel %vm1138_vm6, %v1597_v49, %v1599_v41  ;;  %v1602_v55 = vsel %vm1138_vm6, %v1599_v41, %v1601_v10  ;;  %v3548_v49 = vrot.slane %v5915_v16, 3 }
  0xf2   : > { %v1604_v63 = vsel %vm1138_vm6, %v1601_v10, %v1603_v57  ;;  %v3545_v4 = vsel %vm3538_vm8, %v3542_v58, %v3544_v31  ;;  %v3547_v41 = vsel %vm3538_vm8, %v3544_v31, %v3546_v12  ;;  %v2012_v16 = vshll.u32 %v5706_v21, 16 }
  0xf3   : > { %4742 = vmatmul.mubr.msk.bf16.gmra.mrb[4].mxu1 %vm306_vm2, %v1586_v51  ;;  %v3236_v51 = vshrl.u32 %v6016_v37, 16  ;;  %v3549_v11 = vsel %vm3538_vm8, %v3546_v12, %v3548_v49  ;;  %v2036_v31 = vshrl.u32 %v5824_v1, 16  ;;  %v3560_v12 = vrot.slane %v5971_v54, 3 }
  0xf4   : > { %4745 = vmatprep.mubr.msk.bf16.mxu1 %vm306_vm2, %v1588_v7  ;;  %v3245_v7 = vshrl.u32 %v6019_v3, 16  ;;  %v3562_v54 = vrot.slane %v5984_v20, 3  ;;  %v3566_v20 = vrot.slane %v6000_v0, 3 }
  0xf5   : > { %4906 = vmatmul.mubr.msk.bf16.gmra.mrb[16].mxu0 %vm306_vm2, %v3189_v17  ;;  %v3238_v17 = vrot.slane %v3236_v51, 2 }
  0xf6   : > { %4909 = vmatprep.mubr.msk.bf16.mxu0 %vm306_vm2, %v3198_v24  ;;  %v3234_v24 = vsel %vm3091_vm7, %v3224_v15, %v3233_v40  ;;  %v3247_v43 = vrot.slane %v3245_v7, 2  ;;  %v1609_v7 = vrot.slane %v5824_v1, 1 }
  0xf7   : > { %v3242_v47 = vor.u32 %v3241_v33, %v3238_v17  ;;  %v1994_v17 = vshll.u32 %v5658_v46, 16  ;;  %v1613_v46 = vrot.slane %v5379_v35, 1 }
  0xf8   : > { %v3251_v45 = vor.u32 %v3250_v18, %v3247_v43  ;;  %v1993_v43 = vrot.slane %v1991_v5, 1  ;;  %v2038_v5 = vrot.slane %v2036_v31, 1 }
  0xf9   : > { %v3243_v48 = vsel %vm3091_vm7, %v3233_v40, %v3242_v47  ;;  %v1996_v18 = vrot.slane %v1994_v17, 2 }
  0xfa   : > { %v3252_v6 = vsel %vm3091_vm7, %v3242_v47, %v3251_v45  ;;  %v5390_v47 = vld [vmem:[%s5460_s27 + $0x68] sm:$0xff]  }
  0xfb   : > { %4746 = vmatmul.mubr.msk.bf16.gmra.mrb[8].mxu1 %vm306_vm2, %v1590_v59  ;;  %v3254_v59 = vshrl.u32 %v6146_v62, 16 }
  0xfc   : > { %4749 = vmatprep.mubr.msk.bf16.mxu1 %vm306_vm2, %v1592_v26  ;;  %v3532_v26 = vld [vmem:[%s5460_s27 + $0x10] sm:$0x8] }
  0xfd   : > { %4910 = vmatmul.mubr.msk.bf16.gmra.mrb[20].mxu0 %vm306_vm2, %v3207_v29  ;;  %v3256_v13 = vrot.slane %v3254_v59, 2  ;;  %v3259_v29 = vrot.slane %v3257_v27, 3  ;;  %v4357_v28 = vcombine.low %v3532_v26, %v5856_v19  ;;  %v1605_v19 = vrot.slane %v5770_v61, 1 }
  0xfe   : > { %4913 = vmatprep.mubr.msk.bf16.mxu0 %vm306_vm2, %v3216_v22  ;;  %v2003_v59 = vshll.u32 %v5390_v47, 16  ;;  %v1997_v27 = vor.u32 %v1996_v18, %v1993_v43 }
  0xff   : > { %v3260_v22 = vor.u32 %v3259_v29, %v3256_v13  ;;  %v3539_v9 = vrot.slane %v4357_v28, 3  ;;  %v1606_v51 = vsel %vm1138_vm6, %v1603_v57, %v1605_v19  ;;  %v3552_v29 = vrot.slane %v5938_v2, 3 }
 0x100   : > { %v2005_v13 = vrot.slane %v2003_v59, 2  ;;  %v1998_v10 = vsel %vm1891_vm3, %v5578_v52, %v1997_v27  ;;  %v2014_v28 = vrot.slane %v2012_v16, 2  ;;  %v2027_v2 = vshrl.u32 %v5789_v14, 16 }
 0x101   : > { %v3261_v53 = vsel %vm3091_vm7, %v3251_v45, %v3260_v22  ;;  %v3541_v15 = vsel %vm3538_vm8, %v3539_v9, %v3540_v60  ;;  %v2009_v45 = vshrl.u32 %v5706_v21, 16  ;;  %v2021_v22 = vshll.u32 %v5770_v61, 16 }
 0x102   : > { %v2030_v52 = vshll.u32 %v5789_v14, 16 }
 0x103   : > { %4750 = vmatmul.mubr.msk.bf16.gmra.mrb[12].mxu1 %vm306_vm2, %v1594_v25  ;;  %v1607_v25 = vrot.slane %v5789_v14, 1 }
 0x104   : > { %4753 = vmatprep.mubr.msk.bf16.mxu1 %vm306_vm2, %v1596_v8  ;;  %v3543_v8 = vsel %vm3538_vm8, %v3540_v60, %v3542_v58  ;;  %v3554_v60 = vrot.slane %v5950_v34, 3  ;;  %v2032_v58 = vrot.slane %v2030_v52, 2  ;;  %v2039_v34 = vshll.u32 %v5824_v1, 16 }
 0x105   : > { %4914 = vmatmul.mubr.msk.bf16.gmra.mrb[24].mxu0 %vm306_vm2, %v3225_v30  ;;  %v1608_v40 = vsel %vm1138_vm6, %v1605_v19, %v1607_v25  ;;  %v1611_v30 = vrot.slane %v5829_v36, 1  ;;  %v1610_v33 = vsel %vm1138_vm6, %v1607_v25, %v1609_v7  ;;  %v2023_v19 = vrot.slane %v2021_v22, 2 }
 0x106   : > { %4917 = vmatprep.mubr.msk.bf16.mxu0 %vm306_vm2, %v3234_v24  ;;  %v2029_v25 = vrot.slane %v2027_v2, 1  ;;  %v3555_v14 = vsel %vm3538_vm8, %v3552_v29, %v3554_v60  ;;  %v2041_v17 = vrot.slane %v2039_v34, 2 }
 0x107   : > { %v1612_v24 = vsel %vm1138_vm6, %v1609_v7, %v1611_v30  ;;  %v1614_v26 = vsel %vm1138_vm6, %v1611_v30, %v1613_v46  ;;  %v2048_v7 = vshll.u32 %v5829_v36, 16 }
 0x109   : > { %v2050_v35 = vrot.slane %v2048_v7, 2 }
 0x10b   : > { %4754 = vmatmul.mubr.msk.bf16.gmra.mrb[16].mxu1 %vm306_vm2, %v1598_v23  ;;  %v2000_v23 = vshrl.u32 %v5390_v47, 16 }
 0x10c   : > { %4757 = vmatprep.mubr.msk.bf16.mxu1 %vm306_vm2, %v1600_v42  ;;  %v3550_v42 = vrot.slane %v5934_v50, 3  ;;  %v2018_v50 = vshrl.u32 %v5770_v61, 16 }
 0x10d   : > { %4918 = vmatmul.mubr.msk.bf16.gmra.mrb[28].mxu0 %vm306_vm2, %v3243_v48  ;;  %v2002_v48 = vrot.slane %v2000_v23, 1  ;;  %v3564_v23 = vrot.slane %v5988_v56, 3  ;;  %v3568_v56 = vrot.slane %v6004_v32, 3  ;;  %v3574_v32 = vrot.slane %v6146_v62, 3 }
 0x10e   : > { %4921 = vmatprep.mubr.msk.bf16.mxu0 %vm306_vm2, %v3252_v6  ;;  %v2011_v6 = vrot.slane %v2009_v45, 1  ;;  %v3551_v21 = vsel %vm3538_vm8, %v3548_v49, %v3550_v42  ;;  %v2042_v49 = vor.u32 %v2041_v17, %v2038_v5 }
 0x10f   : > { %v2006_v57 = vor.u32 %v2005_v13, %v2002_v48  ;;  %v3567_v16 = vsel %vm3538_vm8, %v3564_v23, %v3566_v20  ;;  %v3572_v48 = vrot.slane %v6019_v3, 3 }
 0x110   : > { %v2015_v9 = vor.u32 %v2014_v28, %v2011_v6 }
 0x112   : > { %v2016_v61 = vsel %vm1891_vm3, %v2006_v57, %v2015_v9 }
 0x113   : > { %4758 = vmatmul.mubr.msk.bf16.gmra.mrb[20].mxu1 %vm306_vm2, %v1602_v55  ;;  %v3553_v55 = vsel %vm3538_vm8, %v3550_v42, %v3552_v29  ;;  %v3569_v42 = vsel %vm3538_vm8, %v3566_v20, %v3568_v56  ;;  %v3575_v29 = vsel %vm3538_vm8, %v3572_v48, %v3574_v32 }
 0x114   : > { %4761 = vmatprep.mubr.msk.bf16.mxu1 %vm306_vm2, %v1604_v63  ;;  %v2007_v63 = vsel %vm1891_vm3, %v1997_v27, %v2006_v57  ;;  %v3565_v27 = vsel %vm3538_vm8, %v3562_v54, %v3564_v23 }
 0x115   : > { %4922 = vmatmul.mubr.msk.bf16.gmra.mrb[32].mxu0 %vm306_vm2, %v3261_v53  ;;  %v2020_v53 = vrot.slane %v2018_v50, 1 }
 0x116   : > { %4927 = vmatprep.mubr.msk.bf16.mxu0 %vm306_vm2, %v3541_v15  ;;  %v3556_v15 = vrot.slane %v5954_v39, 3  ;;  %v2045_v39 = vshrl.u32 %v5829_v36, 16 }
 0x11b   : > { %4762 = vmatmul.mubr.msk.bf16.gmra.mrb[24].mxu1 %vm306_vm2, %v1606_v51  ;;  %v2024_v51 = vor.u32 %v2023_v19, %v2020_v53 }
 0x11c   : > { %4765 = vmatprep.mubr.msk.bf16.mxu1 %vm306_vm2, %v1608_v40  ;;  %v3557_v40 = vsel %vm3538_vm8, %v3554_v60, %v3556_v15 }
 0x11d   : > { %4928 = vmatmul.mubr.msk.bf16.vlgmr.msra.gmra.mrb[0].mxu0 %vm306_vm2, %v3543_v8  ;;  %v2033_v8 = vor.u32 %v2032_v58, %v2029_v25  ;;  %v2025_v30 = vsel %vm1891_vm3, %v2015_v9, %v2024_v51  ;;  %v6296_v25 = vld [vmem:[%s6451_s2] ss:$0 sm:$0xff] }
 0x11e   : > { %4931 = vmatprep.mubr.msk.bf16.mxu0 %vm306_vm2, %v3545_v4  ;;  %v3558_v4 = vrot.slane %v5966_v44, 3  ;;  %v2057_v44 = vshll.u32 %v5864_v38, 16 }
 0x11f   : > { %v2034_v1 = vsel %vm1891_vm3, %v2024_v51, %v2033_v8 }
 0x120   : > { %v3559_v36 = vsel %vm3538_vm8, %v3556_v15, %v3558_v4  ;;  %v3561_v43 = vsel %vm3538_vm8, %v3558_v4, %v3560_v12  ;;  %v2059_v47 = vrot.slane %v2057_v44, 2 }
 0x123   : > { %4766 = vmatmul.mubr.msk.bf16.gmra.mrb[28].mxu1 %vm306_vm2, %v1610_v33  ;;  %v2047_v33 = vrot.slane %v2045_v39, 1 }
 0x124   : > { %4769 = vmatprep.mubr.msk.bf16.mxu1 %vm306_vm2, %v1612_v24  ;;  %v2054_v24 = vshrl.u32 %v5864_v38, 16  ;;  %v3563_v38 = vsel %vm3538_vm8, %v3560_v12, %v3562_v54 }
 0x125   : > { %4932 = vmatmul.mubr.msk.bf16.gmra.mrb[4].mxu0 %vm306_vm2, %v3547_v41  ;;  %v2051_v18 = vor.u32 %v2050_v35, %v2047_v33  ;;  %v2043_v41 = vsel %vm1891_vm3, %v2033_v8, %v2042_v49 }
 0x126   : > { %4935 = vmatprep.mubr.msk.bf16.mxu0 %vm306_vm2, %v3549_v11  ;;  %v2056_v46 = vrot.slane %v2054_v24, 1 }
 0x127   : > { %v2052_v59 = vsel %vm1891_vm3, %v2042_v49, %v2051_v18 }
 0x128   : > { %v2060_v11 = vor.u32 %v2059_v47, %v2056_v46 }
 0x12a   : > { %v2061_v45 = vsel %vm1891_vm3, %v2051_v18, %v2060_v11 }
 0x12b   : > { %4770 = vmatmul.mubr.msk.bf16.gmra.mrb[32].mxu1 %vm306_vm2, %v1614_v26  ;;  %v3570_v26 = vrot.slane %v6016_v37, 3 }
 0x12c   : > { %4795 = vmatprep.mubr.msk.bf16.mxu1 %vm306_vm2, %v1998_v10 }
 0x12d   : > { %4936 = vmatmul.mubr.msk.bf16.gmra.mrb[8].mxu0 %vm306_vm2, %v3551_v21  ;;  %v3571_v0 = vsel %vm3538_vm8, %v3568_v56, %v3570_v26  ;;  %v3573_v13 = vsel %vm3538_vm8, %v3570_v26, %v3572_v48 }
 0x12e   : > { %4939 = vmatprep.mubr.msk.bf16.mxu0 %vm306_vm2, %v3553_v55 }
 0x133   : > { %4796 = vmatmul.mubr.msk.bf16.vlgmr.msra.gmra.mrb[20].mxu1 %vm306_vm2, %v2007_v63 }
 0x134   : > { %4799 = vmatprep.mubr.msk.bf16.mxu1 %vm306_vm2, %v2016_v61 }
 0x135   : > { %4940 = vmatmul.mubr.msk.bf16.gmra.mrb[12].mxu0 %vm306_vm2, %v3555_v14 }
 0x136   : > { %4943 = vmatprep.mubr.msk.bf16.mxu0 %vm306_vm2, %v3557_v40 }
 0x13b   : > { %4800 = vmatmul.mubr.msk.bf16.gmra.mrb[24].mxu1 %vm306_vm2, %v2025_v30 }
 0x13c   : > { %4803 = vmatprep.mubr.msk.bf16.mxu1 %vm306_vm2, %v2034_v1 }
 0x13d   : > { %4944 = vmatmul.mubr.msk.bf16.gmra.mrb[16].mxu0 %vm306_vm2, %v3559_v36 }
 0x13e   : > { %4947 = vmatprep.mubr.msk.bf16.mxu0 %vm306_vm2, %v3561_v43 }
 0x143   : > { %4804 = vmatmul.mubr.msk.bf16.gmra.mrb[28].mxu1 %vm306_vm2, %v2043_v41 }
 0x144   : > { %4807 = vmatprep.mubr.msk.bf16.mxu1 %vm306_vm2, %v2052_v59 }
 0x145   : > { %4948 = vmatmul.mubr.msk.bf16.gmra.mrb[20].mxu0 %vm306_vm2, %v3563_v38 }
 0x146   : > { %4951 = vmatprep.mubr.msk.bf16.mxu0 %vm306_vm2, %v3565_v27 }
 0x14b   : > { %4808 = vmatmul.mubr.msk.bf16.gmra.mrb[32].mxu1 %vm306_vm2, %v2061_v45 }
 0x14d   : > { %4952 = vmatmul.mubr.msk.bf16.gmra.mrb[24].mxu0 %vm306_vm2, %v3567_v16 }
 0x14e   : > { %4955 = vmatprep.mubr.msk.bf16.mxu0 %vm306_vm2, %v3569_v42 }
 0x155   : > { %4956 = vmatmul.mubr.msk.bf16.gmra.mrb[28].mxu0 %vm306_vm2, %v3571_v0 }
 0x156   : > { %4959 = vmatprep.mubr.msk.bf16.mxu0 %vm306_vm2, %v3573_v13 }
 0x15d   : > { %4960 = vmatmul.mubr.msk.bf16.gmra.mrb[32].mxu0 %vm306_vm2, %v3575_v29 }
 0x1be   : > { %v4739_v10 = vpop.f32.mrb[0].mxu1 }
 0x1bf   : > { %v1706_v6 = vpop.f32.mrb[1].mxu1  ;;  %v4965_v58 = vadd.f32 %v4739_v10, %v6296_v25 }
 0x1c0   : > { %v4740_v28 = vpop.f32.mrb[2].mxu1  ;;  %v4967_v14 = vadd.f32 %v6296_v25, %v1706_v6 }
 0x1c1   : > { %v1709_v37 = vpop.f32.mrb[3].mxu1  ;;  %v4969_v31 = vadd.f32 %v4740_v28, %v6296_v25 }
 0x1c2   : > { %v4971_v8 = vadd.f32 %v6296_v25, %v1709_v37 }
 0x1c6   : > { %v4743_v21 = vpop.f32.mrb[4].mxu1 }
 0x1c7   : > { %v1722_v3 = vpop.f32.mrb[5].mxu1  ;;  %v4973_v49 = vadd.f32 %v4743_v21, %v6296_v25 }
 0x1c8   : > { %v4744_v57 = vpop.f32.mrb[6].mxu1  ;;  %v4975_v44 = vadd.f32 %v6296_v25, %v1722_v3 }
 0x1c9   : > { %v1725_v50 = vpop.f32.mrb[7].mxu1  ;;  %v4977_v54 = vadd.f32 %v4744_v57, %v6296_v25 }
 0x1ca   : > { %v4979_v47 = vadd.f32 %v6296_v25, %v1725_v50 }
 0x1ce   : > { %v4747_v22 = vpop.f32.mrb[8].mxu1 }
 0x1cf   : > { %v1738_v55 = vpop.f32.mrb[9].mxu1  ;;  %v4981_v48 = vadd.f32 %v4747_v22, %v6296_v25 }
 0x1d0   : > { %v6273_v9 = vpop.f32.mrb[10].mxu1  ;;  %v4983_v13 = vadd.f32 %v6296_v25, %v1738_v55 }
 0x1d1   : > { %v6275_v2 = vpop.f32.mrb[11].mxu1  ;;  %v4985_v10 = vadd.f32 %v6273_v9, %v6296_v25 }
 0x1d2   : > { %v4987_v37 = vadd.f32 %v6296_v25, %v6275_v2 }
 0x1d6   : > { %v6277_v62 = vpop.f32.mrb[12].mxu1 }
 0x1d7   : > { %v6279_v52 = vpop.f32.mrb[13].mxu1 }
 0x1d8   : > { %v6281_v60 = vpop.f32.mrb[14].mxu1 }
 0x1d9   : > { %v6283_v63 = vpop.f32.mrb[15].mxu1 }
 0x1de   : > { %v6285_v53 = vpop.f32.mrb[16].mxu1 }
 0x1df   : > { %v6287_v19 = vpop.f32.mrb[17].mxu1 }
 0x1e0   : > { %v6289_v15 = vpop.f32.mrb[18].mxu1 }
 0x1e1   : > { %v6291_v61 = vpop.f32.mrb[19].mxu1 }
 0x1f0   : > { %v4929_v51 = vpop.f32.mrb[0].mxu0 }
 0x1f1   : > { %v4966_v34 = vadd.f32 %v4965_v58, %v4929_v51  ;;  %v3667_v40 = vpop.f32.mrb[1].mxu0 }
 0x1f2   : > { %v4968_v39 = vadd.f32 %v4967_v14, %v3667_v40  ;;  %v4930_v7 = vpop.f32.mrb[2].mxu0 }
 0x1f3   : > { %v3848_v4 = vmax.f32 %v4966_v34, 0.0  ;;  %v4970_v30 = vadd.f32 %v4969_v31, %v4930_v7  ;;  %v3670_v5 = vpop.f32.mrb[3].mxu0 }
 0x1f4   : > { %v3846_v17 = vmax.f32 %v4968_v39, 0.0  ;;  %v4972_v12 = vadd.f32 %v4971_v8, %v3670_v5  ;;  %v4989_v8 = vadd.f32 %v6277_v62, %v6296_v25  ;;  %v4995_v62 = vadd.f32 %v6296_v25, %v6283_v63 }
 0x1f5   : > { %v4416_v1 = vpack.c.bf16 %v3848_v4, %v3848_v4  ;;  %v3849_v33 = vmax.f32 %v4970_v30, 0.0  ;;  %v4991_v4 = vadd.f32 %v6296_v25, %v6279_v52 }
 0x1f6   : > { %v4414_v35 = vpack.c.bf16 %v3846_v17, %v3846_v17  ;;  %v3847_v36 = vmax.f32 %v4972_v12, 0.0  ;;  %v4993_v17 = vadd.f32 %v6281_v60, %v6296_v25 }
 0x1f7   : > { %4029 = vst.msk [vmem:[%s6306_s16 + $0x8] sm:$0xf] %vm4026_vm9, %v4416_v1  ;;  %v4417_v24 = vpack.c.bf16 %v3849_v33, %v3849_v33 }
 0x1f8   : > { %4027 = vst.msk [vmem:[%s6306_s16] sm:$0xf] %vm4026_vm9, %v4414_v35  ;;  %v4415_v43 = vpack.c.bf16 %v3847_v36, %v3847_v36  ;;  %v4933_v18 = vpop.f32.mrb[4].mxu0 }
 0x1f9   : > { %4030 = vst.msk [vmem:[%s6306_s16 + $0xc] sm:$0xf] %vm4026_vm9, %v4417_v24  ;;  %v4974_v41 = vadd.f32 %v4973_v49, %v4933_v18  ;;  %v3683_v46 = vpop.f32.mrb[5].mxu0 }
 0x1fa   : > { %4028 = vst.msk [vmem:[%s6306_s16 + $0x4] sm:$0xf] %vm4026_vm9, %v4415_v43  ;;  %v4976_v23 = vadd.f32 %v4975_v44, %v3683_v46  ;;  %v4934_v59 = vpop.f32.mrb[6].mxu0 }
 0x1fb   : > { %v3852_v38 = vmax.f32 %v4974_v41, 0.0  ;;  %v4978_v11 = vadd.f32 %v4977_v54, %v4934_v59  ;;  %v3686_v27 = vpop.f32.mrb[7].mxu0 }
 0x1fc   : > { %v3850_v20 = vmax.f32 %v4976_v23, 0.0  ;;  %v4980_v45 = vadd.f32 %v4979_v47, %v3686_v27  ;;  %v4997_v47 = vadd.f32 %v6285_v53, %v6296_v25  ;;  %v5003_v53 = vadd.f32 %v6296_v25, %v6291_v61 }
 0x1fd   : > { %v4420_v56 = vpack.c.bf16 %v3852_v38, %v3852_v38  ;;  %v3853_v16 = vmax.f32 %v4978_v11, 0.0  ;;  %v4999_v38 = vadd.f32 %v6296_v25, %v6287_v19 }
 0x1fe   : > { %v4418_v42 = vpack.c.bf16 %v3850_v20, %v3850_v20  ;;  %v3851_v26 = vmax.f32 %v4980_v45, 0.0  ;;  %v5001_v20 = vadd.f32 %v6289_v15, %v6296_v25 }
 0x1ff   : > { %4033 = vst.msk [vmem:[%s6306_s16 + $0x18] sm:$0xf] %vm4026_vm9, %v4420_v56  ;;  %v4421_v0 = vpack.c.bf16 %v3853_v16, %v3853_v16 }
 0x200   : > { %4031 = vst.msk [vmem:[%s6306_s16 + $0x10] sm:$0xf] %vm4026_vm9, %v4418_v42  ;;  %v4419_v32 = vpack.c.bf16 %v3851_v26, %v3851_v26  ;;  %v4937_v29 = vpop.f32.mrb[8].mxu0 }
 0x201   : > { %4034 = vst.msk [vmem:[%s6306_s16 + $0x1c] sm:$0xf] %vm4026_vm9, %v4421_v0  ;;  %v4982_v6 = vadd.f32 %v4981_v48, %v4937_v29  ;;  %v3699_v28 = vpop.f32.mrb[9].mxu0 }
 0x202   : > { %4032 = vst.msk [vmem:[%s6306_s16 + $0x14] sm:$0xf] %vm4026_vm9, %v4419_v32  ;;  %v4984_v21 = vadd.f32 %v4983_v13, %v3699_v28  ;;  %v4938_v3 = vpop.f32.mrb[10].mxu0 }
 0x203   : > { %v3856_v57 = vmax.f32 %v4982_v6, 0.0  ;;  %v4986_v50 = vadd.f32 %v4985_v10, %v4938_v3  ;;  %v3702_v22 = vpop.f32.mrb[11].mxu0 }
 0x204   : > { %v3854_v55 = vmax.f32 %v4984_v21, 0.0  ;;  %v4988_v58 = vadd.f32 %v4987_v37, %v3702_v22 }
 0x205   : > { %v4424_v9 = vpack.c.bf16 %v3856_v57, %v3856_v57  ;;  %v3857_v51 = vmax.f32 %v4986_v50, 0.0 }
 0x206   : > { %v6334_v14 = vpop.f32.mrb[20].mxu1  ;;  %v4422_v34 = vpack.c.bf16 %v3854_v55, %v3854_v55  ;;  %v3855_v2 = vmax.f32 %v4988_v58, 0.0 }
 0x207   : > { %v6336_v31 = vpop.f32.mrb[21].mxu1  ;;  %4037 = vst.msk [vmem:[%s6306_s16 + $0x28] sm:$0xf] %vm4026_vm9, %v4424_v9  ;;  %v4425_v39 = vpack.c.bf16 %v3857_v51, %v3857_v51  ;;  %v5005_v37 = vadd.f32 %v6334_v14, %v6296_v25 }
 0x208   : > { %v6338_v40 = vpop.f32.mrb[22].mxu1  ;;  %4035 = vst.msk [vmem:[%s6306_s16 + $0x20] sm:$0xf] %vm4026_vm9, %v4422_v34  ;;  %v4423_v30 = vpack.c.bf16 %v3855_v2, %v3855_v2  ;;  %v4941_v5 = vpop.f32.mrb[12].mxu0  ;;  %v5007_v57 = vadd.f32 %v6296_v25, %v6336_v31 }
 0x209   : > { %v6344_v7 = vpop.f32.mrb[23].mxu1  ;;  %4038 = vst.msk [vmem:[%s6306_s16 + $0x2c] sm:$0xf] %vm4026_vm9, %v4425_v39  ;;  %v4990_v12 = vadd.f32 %v4989_v8, %v4941_v5  ;;  %v3715_v1 = vpop.f32.mrb[13].mxu0  ;;  %v5009_v55 = vadd.f32 %v6338_v40, %v6296_v25 }
 0x20a   : > { %4036 = vst.msk [vmem:[%s6306_s16 + $0x24] sm:$0xf] %vm4026_vm9, %v4423_v30  ;;  %v4992_v33 = vadd.f32 %v4991_v4, %v3715_v1  ;;  %v4942_v35 = vpop.f32.mrb[14].mxu0  ;;  %v5011_v14 = vadd.f32 %v6296_v25, %v6344_v7 }
 0x20b   : > { %v3860_v52 = vmax.f32 %v4990_v12, 0.0  ;;  %v4994_v36 = vadd.f32 %v4993_v17, %v4942_v35  ;;  %v3718_v49 = vpop.f32.mrb[15].mxu0 }
 0x20c   : > { %v3858_v24 = vmax.f32 %v4992_v33, 0.0  ;;  %v4996_v44 = vadd.f32 %v4995_v62, %v3718_v49 }
 0x20d   : > { %v4428_v60 = vpack.c.bf16 %v3860_v52, %v3860_v52  ;;  %v3861_v18 = vmax.f32 %v4994_v36, 0.0 }
 0x20e   : > { %v6358_v43 = vpop.f32.mrb[24].mxu1  ;;  %v4426_v41 = vpack.c.bf16 %v3858_v24, %v3858_v24  ;;  %v3859_v63 = vmax.f32 %v4996_v44, 0.0 }
 0x20f   : > { %v6360_v54 = vpop.f32.mrb[25].mxu1  ;;  %4041 = vst.msk [vmem:[%s6306_s16 + $0x38] sm:$0xf] %vm4026_vm9, %v4428_v60  ;;  %v4429_v23 = vpack.c.bf16 %v3861_v18, %v3861_v18  ;;  %v5013_v62 = vadd.f32 %v6358_v43, %v6296_v25 }
 0x210   : > { %v6362_v46 = vpop.f32.mrb[26].mxu1  ;;  %4039 = vst.msk [vmem:[%s6306_s16 + $0x30] sm:$0xf] %vm4026_vm9, %v4426_v41  ;;  %v4427_v11 = vpack.c.bf16 %v3859_v63, %v3859_v63  ;;  %v4945_v27 = vpop.f32.mrb[16].mxu0  ;;  %v5015_v52 = vadd.f32 %v6296_v25, %v6360_v54 }
 0x211   : > { %v6368_v59 = vpop.f32.mrb[27].mxu1  ;;  %4042 = vst.msk [vmem:[%s6306_s16 + $0x3c] sm:$0xf] %vm4026_vm9, %v4429_v23  ;;  %v4998_v45 = vadd.f32 %v4997_v47, %v4945_v27  ;;  %v3731_v56 = vpop.f32.mrb[17].mxu0  ;;  %v5017_v24 = vadd.f32 %v6362_v46, %v6296_v25 }
 0x212   : > { %4040 = vst.msk [vmem:[%s6306_s16 + $0x34] sm:$0xf] %vm4026_vm9, %v4427_v11  ;;  %v5000_v16 = vadd.f32 %v4999_v38, %v3731_v56  ;;  %v4946_v42 = vpop.f32.mrb[18].mxu0  ;;  %v5019_v43 = vadd.f32 %v6296_v25, %v6368_v59 }
 0x213   : > { %v3864_v19 = vmax.f32 %v4998_v45, 0.0  ;;  %v5002_v26 = vadd.f32 %v5001_v20, %v4946_v42  ;;  %v3734_v48 = vpop.f32.mrb[19].mxu0 }
 0x214   : > { %v3862_v0 = vmax.f32 %v5000_v16, 0.0  ;;  %v5004_v13 = vadd.f32 %v5003_v53, %v3734_v48 }
 0x215   : > { %v4432_v15 = vpack.c.bf16 %v3864_v19, %v3864_v19  ;;  %v3865_v29 = vmax.f32 %v5002_v26, 0.0 }
 0x216   : > { %v4805_v32 = vpop.f32.mrb[28].mxu1  ;;  %v4430_v6 = vpack.c.bf16 %v3862_v0, %v3862_v0  ;;  %v3863_v28 = vmax.f32 %v5004_v13, 0.0 }
 0x217   : > { %v2265_v10 = vpop.f32.mrb[29].mxu1  ;;  %4045 = vst.msk [vmem:[%s6306_s16 + $0x48] sm:$0xf] %vm4026_vm9, %v4432_v15  ;;  %v4433_v21 = vpack.c.bf16 %v3865_v29, %v3865_v29  ;;  %v5021_v45 = vadd.f32 %v4805_v32, %v6296_v25 }
 0x218   : > { %v4806_v61 = vpop.f32.mrb[30].mxu1  ;;  %4043 = vst.msk [vmem:[%s6306_s16 + $0x40] sm:$0xf] %vm4026_vm9, %v4430_v6  ;;  %v4431_v50 = vpack.c.bf16 %v3863_v28, %v3863_v28  ;;  %v4949_v22 = vpop.f32.mrb[20].mxu0  ;;  %v5023_v56 = vadd.f32 %v6296_v25, %v2265_v10 }
 0x219   : > { %v2268_v3 = vpop.f32.mrb[31].mxu1  ;;  %4046 = vst.msk [vmem:[%s6306_s16 + $0x4c] sm:$0xf] %vm4026_vm9, %v4433_v21  ;;  %v5006_v58 = vadd.f32 %v5005_v37, %v4949_v22  ;;  %v3747_v9 = vpop.f32.mrb[21].mxu0  ;;  %v5025_v42 = vadd.f32 %v4806_v61, %v6296_v25 }
 0x21a   : > { %4044 = vst.msk [vmem:[%s6306_s16 + $0x44] sm:$0xf] %vm4026_vm9, %v4431_v50  ;;  %v5008_v51 = vadd.f32 %v5007_v57, %v3747_v9  ;;  %v4950_v34 = vpop.f32.mrb[22].mxu0  ;;  %v5027_v48 = vadd.f32 %v6296_v25, %v2268_v3 }
 0x21b   : > { %v3868_v31 = vmax.f32 %v5006_v58, 0.0  ;;  %v5010_v2 = vadd.f32 %v5009_v55, %v4950_v34  ;;  %v3750_v8 = vpop.f32.mrb[23].mxu0 }
 0x21c   : > { %v3866_v39 = vmax.f32 %v5008_v51, 0.0  ;;  %v5012_v4 = vadd.f32 %v5011_v14, %v3750_v8 }
 0x21d   : > { %v4436_v40 = vpack.c.bf16 %v3868_v31, %v3868_v31  ;;  %v3869_v5 = vmax.f32 %v5010_v2, 0.0 }
 0x21e   : > { %v4809_v30 = vpop.f32.mrb[32].mxu1  ;;  %v4434_v12 = vpack.c.bf16 %v3866_v39, %v3866_v39  ;;  %v3867_v1 = vmax.f32 %v5012_v4, 0.0 }
 0x21f   : > { %v2281_v17 = vpop.f32.mrb[33].mxu1  ;;  %4049 = vst.msk [vmem:[%s6306_s16 + $0x58] sm:$0xf] %vm4026_vm9, %v4436_v40  ;;  %v4437_v33 = vpack.c.bf16 %v3869_v5, %v3869_v5  ;;  %v5029_v57 = vadd.f32 %v4809_v30, %v6296_v25 }
 0x220   : > { %v4810_v7 = vpop.f32.mrb[34].mxu1  ;;  %4047 = vst.msk [vmem:[%s6306_s16 + $0x50] sm:$0xf] %vm4026_vm9, %v4434_v12  ;;  %v4435_v36 = vpack.c.bf16 %v3867_v1, %v3867_v1  ;;  %v4953_v49 = vpop.f32.mrb[24].mxu0  ;;  %v5031_v50 = vadd.f32 %v6296_v25, %v2281_v17 }
 0x221   : > { %v2284_v35 = vpop.f32.mrb[35].mxu1  ;;  %4050 = vst.msk [vmem:[%s6306_s16 + $0x5c] sm:$0xf] %vm4026_vm9, %v4437_v33  ;;  %v5014_v44 = vadd.f32 %v5013_v62, %v4953_v49  ;;  %v3763_v60 = vpop.f32.mrb[25].mxu0  ;;  %v5033_v58 = vadd.f32 %v4810_v7, %v6296_v25 }
 0x222   : > { %4048 = vst.msk [vmem:[%s6306_s16 + $0x54] sm:$0xf] %vm4026_vm9, %v4435_v36  ;;  %v5016_v18 = vadd.f32 %v5015_v52, %v3763_v60  ;;  %v4954_v54 = vpop.f32.mrb[26].mxu0  ;;  %v5035_v51 = vadd.f32 %v6296_v25, %v2284_v35 }
 0x223   : > { %v3872_v41 = vmax.f32 %v5014_v44, 0.0  ;;  %v5018_v63 = vadd.f32 %v5017_v24, %v4954_v54  ;;  %v3766_v47 = vpop.f32.mrb[27].mxu0 }
 0x224   : > { %v3870_v23 = vmax.f32 %v5016_v18, 0.0  ;;  %v5020_v38 = vadd.f32 %v5019_v43, %v3766_v47 }
 0x225   : > { %v4440_v46 = vpack.c.bf16 %v3872_v41, %v3872_v41  ;;  %v3873_v11 = vmax.f32 %v5018_v63, 0.0 }
 0x226   : > { %v4438_v27 = vpack.c.bf16 %v3870_v23, %v3870_v23  ;;  %v3871_v20 = vmax.f32 %v5020_v38, 0.0 }
 0x227   : > { %4053 = vst.msk [vmem:[%s6306_s16 + $0x68] sm:$0xf] %vm4026_vm9, %v4440_v46  ;;  %v4441_v59 = vpack.c.bf16 %v3873_v11, %v3873_v11 }
 0x228   : > { %4051 = vst.msk [vmem:[%s6306_s16 + $0x60] sm:$0xf] %vm4026_vm9, %v4438_v27  ;;  %v4439_v53 = vpack.c.bf16 %v3871_v20, %v3871_v20  ;;  %v4957_v16 = vpop.f32.mrb[28].mxu0 }
 0x229   : > { %4054 = vst.msk [vmem:[%s6306_s16 + $0x6c] sm:$0xf] %vm4026_vm9, %v4441_v59  ;;  %v5022_v19 = vadd.f32 %v5021_v45, %v4957_v16  ;;  %v3779_v26 = vpop.f32.mrb[29].mxu0 }
 0x22a   : > { %4052 = vst.msk [vmem:[%s6306_s16 + $0x64] sm:$0xf] %vm4026_vm9, %v4439_v53  ;;  %v5024_v0 = vadd.f32 %v5023_v56, %v3779_v26  ;;  %v4958_v13 = vpop.f32.mrb[30].mxu0 }
 0x22b   : > { %v3876_v32 = vmax.f32 %v5022_v19, 0.0  ;;  %v5026_v15 = vadd.f32 %v5025_v42, %v4958_v13  ;;  %v3782_v29 = vpop.f32.mrb[31].mxu0 }
 0x22c   : > { %v3874_v10 = vmax.f32 %v5024_v0, 0.0  ;;  %v5028_v6 = vadd.f32 %v5027_v48, %v3782_v29 }
 0x22d   : > { %v4444_v28 = vpack.c.bf16 %v3876_v32, %v3876_v32  ;;  %v3877_v61 = vmax.f32 %v5026_v15, 0.0 }
 0x22e   : > { %v4442_v37 = vpack.c.bf16 %v3874_v10, %v3874_v10  ;;  %v3875_v21 = vmax.f32 %v5028_v6, 0.0 }
 0x22f   : > { %4057 = vst.msk [vmem:[%s6306_s16 + $0x78] sm:$0xf] %vm4026_vm9, %v4444_v28  ;;  %v4445_v3 = vpack.c.bf16 %v3877_v61, %v3877_v61 }
 0x230   : > { %4055 = vst.msk [vmem:[%s6306_s16 + $0x70] sm:$0xf] %vm4026_vm9, %v4442_v37  ;;  %v4443_v22 = vpack.c.bf16 %v3875_v21, %v3875_v21  ;;  %v4961_v55 = vpop.f32.mrb[32].mxu0 }
 0x231   : > { %4058 = vst.msk [vmem:[%s6306_s16 + $0x7c] sm:$0xf] %vm4026_vm9, %v4445_v3  ;;  %v5030_v9 = vadd.f32 %v5029_v57, %v4961_v55  ;;  %v3795_v14 = vpop.f32.mrb[33].mxu0 }
 0x232   : > { %4056 = vst.msk [vmem:[%s6306_s16 + $0x74] sm:$0xf] %vm4026_vm9, %v4443_v22  ;;  %v5032_v34 = vadd.f32 %v5031_v50, %v3795_v14  ;;  %v4962_v31 = vpop.f32.mrb[34].mxu0 }
 0x233   : > { %v3880_v2 = vmax.f32 %v5030_v9, 0.0  ;;  %v5034_v8 = vadd.f32 %v5033_v58, %v4962_v31  ;;  %v3798_v39 = vpop.f32.mrb[35].mxu0 }
 0x234   : > { %v3878_v4 = vmax.f32 %v5032_v34, 0.0  ;;  %v5036_v30 = vadd.f32 %v5035_v51, %v3798_v39 }
 0x235   : > { %v4448_v40 = vpack.c.bf16 %v3880_v2, %v3880_v2  ;;  %v3881_v5 = vmax.f32 %v5034_v8, 0.0 }
 0x236   : > { %v4446_v17 = vpack.c.bf16 %v3878_v4, %v3878_v4  ;;  %v3879_v12 = vmax.f32 %v5036_v30, 0.0 }
 0x237   : > { %4061 = vst.msk [vmem:[%s6306_s16 + $0x88] sm:$0xf] %vm4026_vm9, %v4448_v40  ;;  %v4449_v1 = vpack.c.bf16 %v3881_v5, %v3881_v5 }
 0x238   : > { %4059 = vst.msk [vmem:[%s6306_s16 + $0x80] sm:$0xf] %vm4026_vm9, %v4446_v17  ;;  %v4447_v25 = vpack.c.bf16 %v3879_v12, %v3879_v12 }
 0x239   : > { %4062 = vst.msk [vmem:[%s6306_s16 + $0x8c] sm:$0xf] %vm4026_vm9, %v4449_v1 }
 0x23a   : > { %4060 = vst.msk [vmem:[%s6306_s16 + $0x84] sm:$0xf] %vm4026_vm9, %v4447_v25 }
 0x23b PF: > { %s13_s12 = sadd.s32 1, %s5397_s12  }
 0x23c   : > { %p10_p4 = scmp.ge.s32.totalorder %s13_s12, 4  }
 0x23e   :  { %12 = sbr.rel (!%p10_p4) target bundleno = 1 (0x1), region = 70 }

</bundles_post_ra>
